<compile_context>
chip_gen: v5e
topology: v5e:2x2
jax: 0.10.0
libtpu: 0.0.40
codegen_flags: <defaults>
</compile_context>

<pallas_src>
import math
from functools import partial

import jax
import jax.numpy as jnp
from jax import lax
from jax.experimental import pallas as pl
from jax.experimental.pallas import tpu as pltpu

EPS = 1e-5  # torch.nn.LayerNorm default eps


def _layernorm(x, gamma, beta):
    mean = jnp.mean(x, axis=-1, keepdims=True)
    var = jnp.mean((x - mean) ** 2, axis=-1, keepdims=True)
    return (x - mean) * lax.rsqrt(var + EPS) * gamma + beta


def _gelu_exact(x):
    # matches torch.nn.functional.gelu default (erf-based)
    return 0.5 * x * (1.0 + lax.erf(x * (1.0 / math.sqrt(2.0))))


# ---------------- fused kernel: LN + QKV + attention + out-proj + MLP ----------------
def _fused_kernel(x_ref, g1_ref, be1_ref, wqkv_ref, bqkv_ref,
                  wo_ref, bo_ref, g2_ref, be2_ref,
                  w1_ref, bm1_ref, w2_ref, bm2_ref,
                  o_ref, m_ref, *, bb, seq, num_heads, head_dim):
    H, D, T = num_heads, head_dim, seq
    C = H * D
    R = bb * T                       # flattened (batch*seq) rows in this grid step
    bf16 = jnp.bfloat16
    f32 = jnp.float32

    # ---- LayerNorm (f32) + fused QKV projection on the flattened [R, C] slab ----
    x = x_ref[...].astype(f32)                                      # [R, C]
    xn = _layernorm(x, g1_ref[...], be1_ref[...])
    # 1/sqrt(D) is pre-folded into the q-columns of wqkv/bqkv (one-time prep);
    # weights are bf16 (MXU native), accumulation stays f32.
    qkv = jnp.dot(xn.astype(bf16), wqkv_ref[...],
                  preferred_element_type=f32) + bqkv_ref[...]       # [R, 3C] f32

    # ---- attention: static loop over heads, batched over the bb sequences ----
    for h in range(H):
        # Head slices taken directly from qkv (no full [R, C] q/k/v copies);
        # [R, D] -> [bb, T, D] only splits the leading dim (layout-free).
        qh = qkv[:, 0 * C + h * D:0 * C + (h + 1) * D].reshape(bb, T, D)
        kh = qkv[:, 1 * C + h * D:1 * C + (h + 1) * D].reshape(bb, T, D)
        vh = qkv[:, 2 * C + h * D:2 * C + (h + 1) * D].reshape(bb, T, D)
        s = lax.dot_general(qh.astype(bf16), kh.astype(bf16),
                            (((2,), (2,)), ((0,), (0,))),
                            preferred_element_type=f32)             # [bb, T, T]
        s = s - jnp.max(s, axis=-1, keepdims=True)
        p = jnp.exp(s)
        p = p * (1.0 / jnp.sum(p, axis=-1, keepdims=True))          # exact softmax denom
        oh = lax.dot_general(p.astype(bf16), vh.astype(bf16),
                             (((2,), (1,)), ((0,), (0,))),
                             preferred_element_type=f32)            # [bb, T, D]
        # m_ref is the contiguous [b, h, t, d] buffer that torch's .view() reads.
        m_ref[:, h * T:(h + 1) * T, :] = oh

    # torch: summed.view(B, T, H*D) on the contiguous [b,h,t,d] buffer (NO head
    # transpose).  Row-major view  =>  attn_in[b][:, i*D:(i+1)*D] == M[b][i::H, :].
    attn_in = jnp.concatenate(
        [m_ref[:, pl.ds(i, T, stride=H), :] for i in range(H)], axis=2)  # [bb, T, C]
    attn_in = attn_in.reshape(R, C)                                  # leading-dim merge

    # ---- output projection + 2*attn residual + MLP(LayerNorm(attn)) -------------
    attn = jnp.dot(attn_in.astype(bf16), wo_ref[...],
                   preferred_element_type=f32) + bo_ref[...]         # [R, C]
    ln2 = _layernorm(attn, g2_ref[...], be2_ref[...])
    hid = _gelu_exact(jnp.dot(ln2.astype(bf16), w1_ref[...],
                              preferred_element_type=f32) + bm1_ref[...])
    mlp = jnp.dot(hid.astype(bf16), w2_ref[...],
                  preferred_element_type=f32) + bm2_ref[...]
    # SelfAttention.forward: x = dropout(attn) + attn + mlp(attn_norm(attn)); dropout=id
    o_ref[...] = (attn + attn + mlp).astype(o_ref.dtype)


# ---------------------------- one-time parameter prep --------------------------------
def prepare_params(params, num_heads):
    """Fuse Q/K/V weights, fold the 1/sqrt(D) attention scale into the q projection,
    cast matmul weights to bf16 (MXU native), keep biases / LayerNorm affines in f32,
    and pre-reshape vectors to [1, N].  Call once, outside the forward path."""
    C = params['wq'].shape[0]
    D = C // num_heads
    scale = 1.0 / math.sqrt(D)
    f32, bf16 = jnp.float32, jnp.bfloat16
    r2 = lambda a: a.reshape(1, -1).astype(f32)
    wqkv = jnp.concatenate([params['wq'] * scale, params['wk'], params['wv']], axis=1)
    bqkv = jnp.concatenate([params['bq'] * scale, params['bk'], params['bv']], axis=0)
    return {
        'ln_qkv_g': r2(params['ln_qkv_g']), 'ln_qkv_b': r2(params['ln_qkv_b']),
        'wqkv': wqkv.astype(bf16), 'bqkv': r2(bqkv),
        'wo': params['wo'].astype(bf16), 'bo': r2(params['bo']),
        'ln_attn_g': r2(params['ln_attn_g']), 'ln_attn_b': r2(params['ln_attn_b']),
        'w1': params['w1'].astype(bf16), 'b1': r2(params['b1']),
        'w2': params['w2'].astype(bf16), 'b2': r2(params['b2']),
    }


def _pick_batch_block(B, T):
    """Largest divisor of B whose flattened row count is <= 512 (fat blocks amortize
    the ~600-cycle per-grid-step cost) while keeping a legal (8,128)-tileable block."""
    best = 1
    for bb in range(1, B + 1):
        if B % bb != 0:
            continue
        rows = bb * T
        if ((rows % 8 == 0) or (bb == B)) and rows <= 512:
            best = bb
    if (best * T) % 8 != 0 and best != B:
        best = B  # full-array block is always a legal BlockSpec
    return best


# --------------------------------- wrapper -------------------------------------------
def self_attention_forward(x, prep, num_heads):
    B, T, C = x.shape
    H = num_heads
    D = C // H
    W = prep['w1'].shape[1]

    Bb = _pick_batch_block(B, T)          # bb sequences per grid step
    R = Bb * T
    grid = (B // Bb,)

    x2 = x.reshape(B * T, C)              # flatten rows (free XLA reshape)

    def const_spec(shape):
        zeros = (0,) * len(shape)
        return pl.BlockSpec(shape, lambda b: zeros)

    row_spec = pl.BlockSpec((R, C), lambda b: (b, 0))

    kernel = partial(_fused_kernel, bb=Bb, seq=T, num_heads=H, head_dim=D)

    # ---- advisory cost estimate (helps XLA schedule around the custom call) ----
    n_rows = B * T
    flops = 2 * n_rows * (3 * C * C + C * C + 2 * C * W) + 4 * B * H * T * T * D
    transcendentals = B * H * T * T + n_rows * W          # softmax exp + gelu erf
    wbytes = 2 * (3 * C * C + C * C + 2 * C * W)          # bf16 matmul weights
    pbytes = 4 * (9 * C + W)                              # f32 biases + LN affines
    bytes_accessed = 4 * 2 * n_rows * C + wbytes + pbytes

    # ---- explicit VMEM budget: double-buffered weights + act blocks + scratch ----
    act_block = 4 * R * C
    scratch_bytes = 4 * Bb * H * T * D
    tmp_bytes = 4 * R * (3 * C + W + 2 * C)               # qkv / hidden temporaries
    needed = 2 * (wbytes + pbytes) + 4 * act_block + scratch_bytes + tmp_bytes
    vmem_limit = int(min(max(2 * needed, 32 * 1024 * 1024), 100 * 1024 * 1024))

    out2 = pl.pallas_call(
        kernel,
        grid=grid,
        in_specs=[row_spec,
                  const_spec((1, C)), const_spec((1, C)),          # qkv LN gamma/beta
                  const_spec((C, 3 * C)), const_spec((1, 3 * C)),  # fused QKV W/b
                  const_spec((C, C)), const_spec((1, C)),          # output proj W/b
                  const_spec((1, C)), const_spec((1, C)),          # attn LN gamma/beta
                  const_spec((C, W)), const_spec((1, W)),          # MLP proj1 W/b
                  const_spec((W, C)), const_spec((1, C))],         # MLP proj2 W/b
        out_specs=row_spec,
        out_shape=jax.ShapeDtypeStruct((B * T, C), x.dtype),
        scratch_shapes=[pltpu.VMEM((Bb, H * T, D), jnp.float32)],  # per-(b,h,t,d) buffer
        compiler_params=pltpu.CompilerParams(
            dimension_semantics=("parallel",),                     # v7x: 2 TCs if grid>1
            vmem_limit_bytes=vmem_limit),
        cost_estimate=pl.CostEstimate(flops=int(flops),
                                      transcendentals=int(transcendentals),
                                      bytes_accessed=int(bytes_accessed)),
    )(x2, prep['ln_qkv_g'], prep['ln_qkv_b'],
      prep['wqkv'], prep['bqkv'],
      prep['wo'], prep['bo'],
      prep['ln_attn_g'], prep['ln_attn_b'],
      prep['w1'], prep['b1'],
      prep['w2'], prep['b2'])
    return out2.reshape(B, T, C)


# --------------------------------- references ----------------------------------------
def reference_forward_f32(x, p, num_heads):
    """Plain-JAX f32 mirror of the PyTorch module (ground-truth semantics)."""
    B, T, C = x.shape
    H = num_heads
    D = C // H

    def ln(y, g, b):
        m = y.mean(-1, keepdims=True)
        v = ((y - m) ** 2).mean(-1, keepdims=True)
        return (y - m) / jnp.sqrt(v + EPS) * g + b

    xn = ln(x, p['ln_qkv_g'], p['ln_qkv_b'])
    q = xn @ p['wq'] + p['bq']
    k = xn @ p['wk'] + p['bk']
    v = xn @ p['wv'] + p['bv']
    qh = q.reshape(B, T, H, D)
    kh = k.reshape(B, T, H, D)
    vh = v.reshape(B, T, H, D)
    att = jnp.einsum('bthd,bThd->bhtT', qh, kh) * (1.0 / math.sqrt(D))
    nrm = jax.nn.softmax(att, axis=-1)
    summed = jnp.einsum('bhtT,bThd->bhtd', nrm, vh).reshape(B, T, H * D)  # torch .view
    attn = summed @ p['wo'] + p['bo']
    ln2 = ln(attn, p['ln_attn_g'], p['ln_attn_b'])
    h = jax.nn.gelu(ln2 @ p['w1'] + p['b1'], approximate=False)
    mlp = h @ p['w2'] + p['b2']
    return attn + attn + mlp


def reference_forward_bf16(x, prep, num_heads):
    """Plain-JAX mirror with the SAME bf16/f32 mixed precision as the kernel."""
    B, T, C = x.shape
    H = num_heads
    D = C // H
    bf16, f32 = jnp.bfloat16, jnp.float32

    def ln(y, g, b):
        m = y.mean(-1, keepdims=True)
        v = ((y - m) ** 2).mean(-1, keepdims=True)
        return (y - m) * lax.rsqrt(v + EPS) * g + b

    dot = lambda a, w: jnp.dot(a.astype(bf16), w, preferred_element_type=f32)
    x2 = x.reshape(B * T, C).astype(f32)
    xn = ln(x2, prep['ln_qkv_g'], prep['ln_qkv_b'])
    qkv = dot(xn, prep['wqkv']) + prep['bqkv']
    heads = []
    for h in range(H):
        qh = qkv[:, 0 * C + h * D:0 * C + (h + 1) * D].reshape(B, T, D)
        kh = qkv[:, 1 * C + h * D:1 * C + (h + 1) * D].reshape(B, T, D)
        vh = qkv[:, 2 * C + h * D:2 * C + (h + 1) * D].reshape(B, T, D)
        s = lax.dot_general(qh.astype(bf16), kh.astype(bf16),
                            (((2,), (2,)), ((0,), (0,))), preferred_element_type=f32)
        s = s - jnp.max(s, axis=-1, keepdims=True)
        p = jnp.exp(s)
        p = p * (1.0 / jnp.sum(p, axis=-1, keepdims=True))
        heads.append(lax.dot_general(p.astype(bf16), vh.astype(bf16),
                                     (((2,), (1,)), ((0,), (0,))),
                                     preferred_element_type=f32))
    summed = jnp.stack(heads, axis=1).reshape(B * T, C)   # [B,H,T,D] -> torch .view
    attn = dot(summed, prep['wo']) + prep['bo']
    ln2 = ln(attn, prep['ln_attn_g'], prep['ln_attn_b'])
    hid = _gelu_exact(dot(ln2, prep['w1']) + prep['b1'])
    mlp = dot(hid, prep['w2']) + prep['b2']
    return (attn + attn + mlp).reshape(B, T, C)


if __name__ == "__main__":
    B, T, C, H, WIDEN = 2, 8, 32, 4, 4   # in_qkv_channels = out_qk_channels = 32
    f = jnp.float32
    keys = jax.random.split(jax.random.PRNGKey(0), 17)
    params = {
        'ln_qkv_g': 1.0 + 0.1 * jax.random.normal(keys[0], (C,), f),
        'ln_qkv_b': 0.05 * jax.random.normal(keys[1], (C,), f),
        'wq': 0.1 * jax.random.normal(keys[2], (C, C), f),
        'bq': 0.05 * jax.random.normal(keys[3], (C,), f),
        'wk': 0.1 * jax.random.normal(keys[4], (C, C), f),
        'bk': 0.05 * jax.random.normal(keys[5], (C,), f),
        'wv': 0.1 * jax.random.normal(keys[6], (C, C), f),
        'bv': 0.05 * jax.random.normal(keys[7], (C,), f),
        'wo': 0.1 * jax.random.normal(keys[8], (C, C), f),
        'bo': 0.05 * jax.random.normal(keys[9], (C,), f),
        'ln_attn_g': 1.0 + 0.1 * jax.random.normal(keys[10], (C,), f),
        'ln_attn_b': 0.05 * jax.random.normal(keys[11], (C,), f),
        'w1': 0.1 * jax.random.normal(keys[12], (C, C * WIDEN), f),
        'b1': 0.05 * jax.random.normal(keys[13], (C * WIDEN,), f),
        'w2': 0.1 * jax.random.normal(keys[14], (C * WIDEN, C), f),
        'b2': 0.05 * jax.random.normal(keys[15], (C,), f),
    }
    x = jax.random.normal(keys[16], (B, T, C), f)

    prep = prepare_params(params, num_heads=H)            # one-time parameter transform
    out = jax.block_until_ready(self_attention_forward(x, prep, num_heads=H))

    ref_bf16 = reference_forward_bf16(x, prep, H)         # precision-matched reference
    ref_f32 = reference_forward_f32(x, params, H)         # true-module f32 reference
    assert out.shape == (B, T, C)
    assert bool(jnp.max(jnp.abs(out - ref_bf16)) < 5e-3), "mismatch vs bf16-matched reference"
    assert bool(jnp.max(jnp.abs(out - ref_f32)) < 2e-1), "bf16 drift vs f32 reference too large"
    print("KERNEL_OK")
</pallas_src>

<mosaic_0001>
module attributes {stable_mosaic.version = 11 : i64} {
  func.func @_fused_kernel(%arg0: i32, %arg1: memref<16x32xf32, #tpu.memory_space<vmem>>, %arg2: memref<1x32xf32, #tpu.memory_space<vmem>>, %arg3: memref<1x32xf32, #tpu.memory_space<vmem>>, %arg4: memref<32x96xbf16, #tpu.memory_space<vmem>>, %arg5: memref<1x96xf32, #tpu.memory_space<vmem>>, %arg6: memref<32x32xbf16, #tpu.memory_space<vmem>>, %arg7: memref<1x32xf32, #tpu.memory_space<vmem>>, %arg8: memref<1x32xf32, #tpu.memory_space<vmem>>, %arg9: memref<1x32xf32, #tpu.memory_space<vmem>>, %arg10: memref<32x128xbf16, #tpu.memory_space<vmem>>, %arg11: memref<1x128xf32, #tpu.memory_space<vmem>>, %arg12: memref<128x32xbf16, #tpu.memory_space<vmem>>, %arg13: memref<1x32xf32, #tpu.memory_space<vmem>>, %arg14: memref<16x32xf32, #tpu.memory_space<vmem>>, %arg15: memref<2x32x8xf32, #tpu.memory_space<vmem>>) attributes {dimension_semantics = [#tpu.dimension_semantics<parallel>], iteration_bounds = array<i64: 1>, scalar_prefetch = 0 : i64, scratch_operands = 1 : i64, tpu.core_type = #tpu.core_type<tc>, window_params = [{transform_indices = @transform_0, window_bounds = array<i64: 16, 32>}, {pipeline_mode = #tpu.pipeline_mode<synchronous>, transform_indices = @transform_1, window_bounds = array<i64: 1, 32>}, {pipeline_mode = #tpu.pipeline_mode<synchronous>, transform_indices = @transform_2, window_bounds = array<i64: 1, 32>}, {pipeline_mode = #tpu.pipeline_mode<synchronous>, transform_indices = @transform_3, window_bounds = array<i64: 32, 96>}, {pipeline_mode = #tpu.pipeline_mode<synchronous>, transform_indices = @transform_4, window_bounds = array<i64: 1, 96>}, {pipeline_mode = #tpu.pipeline_mode<synchronous>, transform_indices = @transform_5, window_bounds = array<i64: 32, 32>}, {pipeline_mode = #tpu.pipeline_mode<synchronous>, transform_indices = @transform_6, window_bounds = array<i64: 1, 32>}, {pipeline_mode = #tpu.pipeline_mode<synchronous>, transform_indices = @transform_7, window_bounds = array<i64: 1, 32>}, {pipeline_mode = #tpu.pipeline_mode<synchronous>, transform_indices = @transform_8, window_bounds = array<i64: 1, 32>}, {pipeline_mode = #tpu.pipeline_mode<synchronous>, transform_indices = @transform_9, window_bounds = array<i64: 32, 128>}, {pipeline_mode = #tpu.pipeline_mode<synchronous>, transform_indices = @transform_10, window_bounds = array<i64: 1, 128>}, {pipeline_mode = #tpu.pipeline_mode<synchronous>, transform_indices = @transform_11, window_bounds = array<i64: 128, 32>}, {pipeline_mode = #tpu.pipeline_mode<synchronous>, transform_indices = @transform_12, window_bounds = array<i64: 1, 32>}, {transform_indices = @transform_13, window_bounds = array<i64: 16, 32>}]} {
    %c0 = arith.constant 0 : index
    %c0_0 = arith.constant 0 : index
    %0 = vector.load %arg1[%c0, %c0_0] : memref<16x32xf32, #tpu.memory_space<vmem>>, vector<16x32xf32>
    %c0_1 = arith.constant 0 : index
    %c0_2 = arith.constant 0 : index
    %1 = vector.load %arg2[%c0_1, %c0_2] : memref<1x32xf32, #tpu.memory_space<vmem>>, vector<1x32xf32>
    %c0_3 = arith.constant 0 : index
    %c0_4 = arith.constant 0 : index
    %2 = vector.load %arg3[%c0_3, %c0_4] : memref<1x32xf32, #tpu.memory_space<vmem>>, vector<1x32xf32>
    %cst = arith.constant dense<0.000000e+00> : vector<16xf32>
    %3 = vector.multi_reduction <add>, %0, %cst [1] : vector<16x32xf32> to vector<16xf32>
    %4 = vector.shape_cast %3 : vector<16xf32> to vector<16x1xf32>
    %cst_5 = arith.constant 3.200000e+01 : f32
    %5 = vector.broadcast %cst_5 : f32 to vector<16x1xf32>
    %6 = arith.divf %4, %5 : vector<16x1xf32>
    %7 = vector.broadcast %6 : vector<16x1xf32> to vector<16x32xf32>
    %8 = arith.subf %0, %7 : vector<16x32xf32>
    %9 = arith.mulf %8, %8 : vector<16x32xf32>
    %cst_6 = arith.constant dense<0.000000e+00> : vector<16xf32>
    %10 = vector.multi_reduction <add>, %9, %cst_6 [1] : vector<16x32xf32> to vector<16xf32>
    %11 = vector.shape_cast %10 : vector<16xf32> to vector<16x1xf32>
    %cst_7 = arith.constant 3.200000e+01 : f32
    %12 = vector.broadcast %cst_7 : f32 to vector<16x1xf32>
    %13 = arith.divf %11, %12 : vector<16x1xf32>
    %14 = vector.broadcast %6 : vector<16x1xf32> to vector<16x32xf32>
    %15 = arith.subf %0, %14 : vector<16x32xf32>
    %cst_8 = arith.constant 9.99999974E-6 : f32
    %16 = vector.broadcast %cst_8 : f32 to vector<16x1xf32>
    %17 = arith.addf %13, %16 : vector<16x1xf32>
    %18 = math.rsqrt %17 : vector<16x1xf32>
    %19 = vector.broadcast %18 : vector<16x1xf32> to vector<16x32xf32>
    %20 = arith.mulf %15, %19 : vector<16x32xf32>
    %21 = vector.broadcast %1 : vector<1x32xf32> to vector<16x32xf32>
    %22 = arith.mulf %20, %21 : vector<16x32xf32>
    %23 = vector.broadcast %2 : vector<1x32xf32> to vector<16x32xf32>
    %24 = arith.addf %22, %23 : vector<16x32xf32>
    %25 = arith.truncf %24 : vector<16x32xf32> to vector<16x32xbf16>
    %c0_9 = arith.constant 0 : index
    %c0_10 = arith.constant 0 : index
    %26 = vector.load %arg4[%c0_9, %c0_10] : memref<32x96xbf16, #tpu.memory_space<vmem>>, vector<32x96xbf16>
    %cst_11 = arith.constant dense<0.000000e+00> : vector<16x96xf32>
    %27 = tpu.matmul %25, %26, %cst_11 {dimension_numbers = #tpu.dot_dimension_numbers<[1], [0], [0], [1], [0, 0, 1, 1], [], []>} : vector<16x32xbf16>, vector<32x96xbf16>, vector<16x96xf32> -> vector<16x96xf32>
    %c0_12 = arith.constant 0 : index
    %c0_13 = arith.constant 0 : index
    %28 = vector.load %arg5[%c0_12, %c0_13] : memref<1x96xf32, #tpu.memory_space<vmem>>, vector<1x96xf32>
    %29 = vector.broadcast %28 : vector<1x96xf32> to vector<16x96xf32>
    %30 = arith.addf %27, %29 : vector<16x96xf32>
    %31 = vector.extract_strided_slice %30 {offsets = [0, 0], sizes = [16, 8], strides = [1, 1]} : vector<16x96xf32> to vector<16x8xf32>
    %32 = vector.shape_cast %31 : vector<16x8xf32> to vector<2x8x8xf32>
    %33 = vector.extract_strided_slice %30 {offsets = [0, 32], sizes = [16, 8], strides = [1, 1]} : vector<16x96xf32> to vector<16x8xf32>
    %34 = vector.shape_cast %33 : vector<16x8xf32> to vector<2x8x8xf32>
    %35 = vector.extract_strided_slice %30 {offsets = [0, 64], sizes = [16, 8], strides = [1, 1]} : vector<16x96xf32> to vector<16x8xf32>
    %36 = vector.shape_cast %35 : vector<16x8xf32> to vector<2x8x8xf32>
    %37 = arith.truncf %32 : vector<2x8x8xf32> to vector<2x8x8xbf16>
    %38 = arith.truncf %34 : vector<2x8x8xf32> to vector<2x8x8xbf16>
    %cst_14 = arith.constant dense<0.000000e+00> : vector<2x8x8xf32>
    %39 = tpu.matmul %37, %38, %cst_14 {dimension_numbers = #tpu.dot_dimension_numbers<[2], [2], [1], [1], [0, 0, 0, 1, 1, 1], [0], [0]>} : vector<2x8x8xbf16>, vector<2x8x8xbf16>, vector<2x8x8xf32> -> vector<2x8x8xf32>
    %cst_15 = arith.constant dense<0xFF800000> : vector<2x8xf32>
    %40 = vector.multi_reduction <maximumf>, %39, %cst_15 [2] : vector<2x8x8xf32> to vector<2x8xf32>
    %41 = vector.shape_cast %40 : vector<2x8xf32> to vector<2x8x1xf32>
    %42 = vector.broadcast %41 : vector<2x8x1xf32> to vector<2x8x8xf32>
    %43 = arith.subf %39, %42 : vector<2x8x8xf32>
    %44 = math.exp %43 : vector<2x8x8xf32>
    %cst_16 = arith.constant dense<0.000000e+00> : vector<2x8xf32>
    %45 = vector.multi_reduction <add>, %44, %cst_16 [2] : vector<2x8x8xf32> to vector<2x8xf32>
    %46 = vector.shape_cast %45 : vector<2x8xf32> to vector<2x8x1xf32>
    %cst_17 = arith.constant 1.000000e+00 : f32
    %47 = vector.broadcast %cst_17 : f32 to vector<2x8x1xf32>
    %48 = arith.divf %47, %46 : vector<2x8x1xf32>
    %49 = vector.broadcast %48 : vector<2x8x1xf32> to vector<2x8x8xf32>
    %50 = arith.mulf %44, %49 : vector<2x8x8xf32>
    %51 = arith.truncf %50 : vector<2x8x8xf32> to vector<2x8x8xbf16>
    %52 = arith.truncf %36 : vector<2x8x8xf32> to vector<2x8x8xbf16>
    %cst_18 = arith.constant dense<0.000000e+00> : vector<2x8x8xf32>
    %53 = tpu.matmul %51, %52, %cst_18 {dimension_numbers = #tpu.dot_dimension_numbers<[2], [1], [1], [2], [0, 0, 0, 1, 1, 2], [0], [0]>} : vector<2x8x8xbf16>, vector<2x8x8xbf16>, vector<2x8x8xf32> -> vector<2x8x8xf32>
    %c0_19 = arith.constant 0 : index
    %c0_20 = arith.constant 0 : index
    %c0_21 = arith.constant 0 : index
    %54 = vector.load %arg15[%c0_19, %c0_20, %c0_21] : memref<2x32x8xf32, #tpu.memory_space<vmem>>, vector<2x8x8xf32>
    tpu.vector_store %arg15[%c0_19, %c0_20, %c0_21], %53 {strides = array<i32>} : memref<2x32x8xf32, #tpu.memory_space<vmem>>, vector<2x8x8xf32>,
    %55 = vector.extract_strided_slice %30 {offsets = [0, 8], sizes = [16, 8], strides = [1, 1]} : vector<16x96xf32> to vector<16x8xf32>
    %56 = vector.shape_cast %55 : vector<16x8xf32> to vector<2x8x8xf32>
    %57 = vector.extract_strided_slice %30 {offsets = [0, 40], sizes = [16, 8], strides = [1, 1]} : vector<16x96xf32> to vector<16x8xf32>
    %58 = vector.shape_cast %57 : vector<16x8xf32> to vector<2x8x8xf32>
    %59 = vector.extract_strided_slice %30 {offsets = [0, 72], sizes = [16, 8], strides = [1, 1]} : vector<16x96xf32> to vector<16x8xf32>
    %60 = vector.shape_cast %59 : vector<16x8xf32> to vector<2x8x8xf32>
    %61 = arith.truncf %56 : vector<2x8x8xf32> to vector<2x8x8xbf16>
    %62 = arith.truncf %58 : vector<2x8x8xf32> to vector<2x8x8xbf16>
    %cst_22 = arith.constant dense<0.000000e+00> : vector<2x8x8xf32>
    %63 = tpu.matmul %61, %62, %cst_22 {dimension_numbers = #tpu.dot_dimension_numbers<[2], [2], [1], [1], [0, 0, 0, 1, 1, 1], [0], [0]>} : vector<2x8x8xbf16>, vector<2x8x8xbf16>, vector<2x8x8xf32> -> vector<2x8x8xf32>
    %cst_23 = arith.constant dense<0xFF800000> : vector<2x8xf32>
    %64 = vector.multi_reduction <maximumf>, %63, %cst_23 [2] : vector<2x8x8xf32> to vector<2x8xf32>
    %65 = vector.shape_cast %64 : vector<2x8xf32> to vector<2x8x1xf32>
    %66 = vector.broadcast %65 : vector<2x8x1xf32> to vector<2x8x8xf32>
    %67 = arith.subf %63, %66 : vector<2x8x8xf32>
    %68 = math.exp %67 : vector<2x8x8xf32>
    %cst_24 = arith.constant dense<0.000000e+00> : vector<2x8xf32>
    %69 = vector.multi_reduction <add>, %68, %cst_24 [2] : vector<2x8x8xf32> to vector<2x8xf32>
    %70 = vector.shape_cast %69 : vector<2x8xf32> to vector<2x8x1xf32>
    %cst_25 = arith.constant 1.000000e+00 : f32
    %71 = vector.broadcast %cst_25 : f32 to vector<2x8x1xf32>
    %72 = arith.divf %71, %70 : vector<2x8x1xf32>
    %73 = vector.broadcast %72 : vector<2x8x1xf32> to vector<2x8x8xf32>
    %74 = arith.mulf %68, %73 : vector<2x8x8xf32>
    %75 = arith.truncf %74 : vector<2x8x8xf32> to vector<2x8x8xbf16>
    %76 = arith.truncf %60 : vector<2x8x8xf32> to vector<2x8x8xbf16>
    %cst_26 = arith.constant dense<0.000000e+00> : vector<2x8x8xf32>
    %77 = tpu.matmul %75, %76, %cst_26 {dimension_numbers = #tpu.dot_dimension_numbers<[2], [1], [1], [2], [0, 0, 0, 1, 1, 2], [0], [0]>} : vector<2x8x8xbf16>, vector<2x8x8xbf16>, vector<2x8x8xf32> -> vector<2x8x8xf32>
    %c0_27 = arith.constant 0 : index
    %c8 = arith.constant 8 : index
    %c0_28 = arith.constant 0 : index
    %78 = vector.load %arg15[%c0_27, %c8, %c0_28] : memref<2x32x8xf32, #tpu.memory_space<vmem>>, vector<2x8x8xf32>
    tpu.vector_store %arg15[%c0_27, %c8, %c0_28], %77 {strides = array<i32>} : memref<2x32x8xf32, #tpu.memory_space<vmem>>, vector<2x8x8xf32>,
    %79 = vector.extract_strided_slice %30 {offsets = [0, 16], sizes = [16, 8], strides = [1, 1]} : vector<16x96xf32> to vector<16x8xf32>
    %80 = vector.shape_cast %79 : vector<16x8xf32> to vector<2x8x8xf32>
    %81 = vector.extract_strided_slice %30 {offsets = [0, 48], sizes = [16, 8], strides = [1, 1]} : vector<16x96xf32> to vector<16x8xf32>
    %82 = vector.shape_cast %81 : vector<16x8xf32> to vector<2x8x8xf32>
    %83 = vector.extract_strided_slice %30 {offsets = [0, 80], sizes = [16, 8], strides = [1, 1]} : vector<16x96xf32> to vector<16x8xf32>
    %84 = vector.shape_cast %83 : vector<16x8xf32> to vector<2x8x8xf32>
    %85 = arith.truncf %80 : vector<2x8x8xf32> to vector<2x8x8xbf16>
    %86 = arith.truncf %82 : vector<2x8x8xf32> to vector<2x8x8xbf16>
    %cst_29 = arith.constant dense<0.000000e+00> : vector<2x8x8xf32>
    %87 = tpu.matmul %85, %86, %cst_29 {dimension_numbers = #tpu.dot_dimension_numbers<[2], [2], [1], [1], [0, 0, 0, 1, 1, 1], [0], [0]>} : vector<2x8x8xbf16>, vector<2x8x8xbf16>, vector<2x8x8xf32> -> vector<2x8x8xf32>
    %cst_30 = arith.constant dense<0xFF800000> : vector<2x8xf32>
    %88 = vector.multi_reduction <maximumf>, %87, %cst_30 [2] : vector<2x8x8xf32> to vector<2x8xf32>
    %89 = vector.shape_cast %88 : vector<2x8xf32> to vector<2x8x1xf32>
    %90 = vector.broadcast %89 : vector<2x8x1xf32> to vector<2x8x8xf32>
    %91 = arith.subf %87, %90 : vector<2x8x8xf32>
    %92 = math.exp %91 : vector<2x8x8xf32>
    %cst_31 = arith.constant dense<0.000000e+00> : vector<2x8xf32>
    %93 = vector.multi_reduction <add>, %92, %cst_31 [2] : vector<2x8x8xf32> to vector<2x8xf32>
    %94 = vector.shape_cast %93 : vector<2x8xf32> to vector<2x8x1xf32>
    %cst_32 = arith.constant 1.000000e+00 : f32
    %95 = vector.broadcast %cst_32 : f32 to vector<2x8x1xf32>
    %96 = arith.divf %95, %94 : vector<2x8x1xf32>
    %97 = vector.broadcast %96 : vector<2x8x1xf32> to vector<2x8x8xf32>
    %98 = arith.mulf %92, %97 : vector<2x8x8xf32>
    %99 = arith.truncf %98 : vector<2x8x8xf32> to vector<2x8x8xbf16>
    %100 = arith.truncf %84 : vector<2x8x8xf32> to vector<2x8x8xbf16>
    %cst_33 = arith.constant dense<0.000000e+00> : vector<2x8x8xf32>
    %101 = tpu.matmul %99, %100, %cst_33 {dimension_numbers = #tpu.dot_dimension_numbers<[2], [1], [1], [2], [0, 0, 0, 1, 1, 2], [0], [0]>} : vector<2x8x8xbf16>, vector<2x8x8xbf16>, vector<2x8x8xf32> -> vector<2x8x8xf32>
    %c0_34 = arith.constant 0 : index
    %c16 = arith.constant 16 : index
    %c0_35 = arith.constant 0 : index
    %102 = vector.load %arg15[%c0_34, %c16, %c0_35] : memref<2x32x8xf32, #tpu.memory_space<vmem>>, vector<2x8x8xf32>
    tpu.vector_store %arg15[%c0_34, %c16, %c0_35], %101 {strides = array<i32>} : memref<2x32x8xf32, #tpu.memory_space<vmem>>, vector<2x8x8xf32>,
    %103 = vector.extract_strided_slice %30 {offsets = [0, 24], sizes = [16, 8], strides = [1, 1]} : vector<16x96xf32> to vector<16x8xf32>
    %104 = vector.shape_cast %103 : vector<16x8xf32> to vector<2x8x8xf32>
    %105 = vector.extract_strided_slice %30 {offsets = [0, 56], sizes = [16, 8], strides = [1, 1]} : vector<16x96xf32> to vector<16x8xf32>
    %106 = vector.shape_cast %105 : vector<16x8xf32> to vector<2x8x8xf32>
    %107 = vector.extract_strided_slice %30 {offsets = [0, 88], sizes = [16, 8], strides = [1, 1]} : vector<16x96xf32> to vector<16x8xf32>
    %108 = vector.shape_cast %107 : vector<16x8xf32> to vector<2x8x8xf32>
    %109 = arith.truncf %104 : vector<2x8x8xf32> to vector<2x8x8xbf16>
    %110 = arith.truncf %106 : vector<2x8x8xf32> to vector<2x8x8xbf16>
    %cst_36 = arith.constant dense<0.000000e+00> : vector<2x8x8xf32>
    %111 = tpu.matmul %109, %110, %cst_36 {dimension_numbers = #tpu.dot_dimension_numbers<[2], [2], [1], [1], [0, 0, 0, 1, 1, 1], [0], [0]>} : vector<2x8x8xbf16>, vector<2x8x8xbf16>, vector<2x8x8xf32> -> vector<2x8x8xf32>
    %cst_37 = arith.constant dense<0xFF800000> : vector<2x8xf32>
    %112 = vector.multi_reduction <maximumf>, %111, %cst_37 [2] : vector<2x8x8xf32> to vector<2x8xf32>
    %113 = vector.shape_cast %112 : vector<2x8xf32> to vector<2x8x1xf32>
    %114 = vector.broadcast %113 : vector<2x8x1xf32> to vector<2x8x8xf32>
    %115 = arith.subf %111, %114 : vector<2x8x8xf32>
    %116 = math.exp %115 : vector<2x8x8xf32>
    %cst_38 = arith.constant dense<0.000000e+00> : vector<2x8xf32>
    %117 = vector.multi_reduction <add>, %116, %cst_38 [2] : vector<2x8x8xf32> to vector<2x8xf32>
    %118 = vector.shape_cast %117 : vector<2x8xf32> to vector<2x8x1xf32>
    %cst_39 = arith.constant 1.000000e+00 : f32
    %119 = vector.broadcast %cst_39 : f32 to vector<2x8x1xf32>
    %120 = arith.divf %119, %118 : vector<2x8x1xf32>
    %121 = vector.broadcast %120 : vector<2x8x1xf32> to vector<2x8x8xf32>
    %122 = arith.mulf %116, %121 : vector<2x8x8xf32>
    %123 = arith.truncf %122 : vector<2x8x8xf32> to vector<2x8x8xbf16>
    %124 = arith.truncf %108 : vector<2x8x8xf32> to vector<2x8x8xbf16>
    %cst_40 = arith.constant dense<0.000000e+00> : vector<2x8x8xf32>
    %125 = tpu.matmul %123, %124, %cst_40 {dimension_numbers = #tpu.dot_dimension_numbers<[2], [1], [1], [2], [0, 0, 0, 1, 1, 2], [0], [0]>} : vector<2x8x8xbf16>, vector<2x8x8xbf16>, vector<2x8x8xf32> -> vector<2x8x8xf32>
    %c0_41 = arith.constant 0 : index
    %c24 = arith.constant 24 : index
    %c0_42 = arith.constant 0 : index
    %126 = vector.load %arg15[%c0_41, %c24, %c0_42] : memref<2x32x8xf32, #tpu.memory_space<vmem>>, vector<2x8x8xf32>
    tpu.vector_store %arg15[%c0_41, %c24, %c0_42], %125 {strides = array<i32>} : memref<2x32x8xf32, #tpu.memory_space<vmem>>, vector<2x8x8xf32>,
    %c0_43 = arith.constant 0 : index
    %c0_44 = arith.constant 0 : index
    %c0_45 = arith.constant 0 : index
    %127 = tpu.strided_load %arg15[%c0_43, %c0_44, %c0_45] {strides = array<i32: 1, 4, 1>} : memref<2x32x8xf32, #tpu.memory_space<vmem>>, vector<2x8x8xf32>
    %c0_46 = arith.constant 0 : index
    %c1 = arith.constant 1 : index
    %c0_47 = arith.constant 0 : index
    %128 = tpu.strided_load %arg15[%c0_46, %c1, %c0_47] {strides = array<i32: 1, 4, 1>} : memref<2x32x8xf32, #tpu.memory_space<vmem>>, vector<2x8x8xf32>
    %c0_48 = arith.constant 0 : index
    %c2 = arith.constant 2 : index
    %c0_49 = arith.constant 0 : index
    %129 = tpu.strided_load %arg15[%c0_48, %c2, %c0_49] {strides = array<i32: 1, 4, 1>} : memref<2x32x8xf32, #tpu.memory_space<vmem>>, vector<2x8x8xf32>
    %c0_50 = arith.constant 0 : index
    %c3 = arith.constant 3 : index
    %c0_51 = arith.constant 0 : index
    %130 = tpu.strided_load %arg15[%c0_50, %c3, %c0_51] {strides = array<i32: 1, 4, 1>} : memref<2x32x8xf32, #tpu.memory_space<vmem>>, vector<2x8x8xf32>
    %131 = tpu.concatenate %127, %128, %129, %130 in 2 : vector<2x8x8xf32>, vector<2x8x8xf32>, vector<2x8x8xf32>, vector<2x8x8xf32> -> vector<2x8x32xf32>
    %132 = vector.shape_cast %131 : vector<2x8x32xf32> to vector<16x32xf32>
    %133 = arith.truncf %132 : vector<16x32xf32> to vector<16x32xbf16>
    %c0_52 = arith.constant 0 : index
    %c0_53 = arith.constant 0 : index
    %134 = vector.load %arg6[%c0_52, %c0_53] : memref<32x32xbf16, #tpu.memory_space<vmem>>, vector<32x32xbf16>
    %cst_54 = arith.constant dense<0.000000e+00> : vector<16x32xf32>
    %135 = tpu.matmul %133, %134, %cst_54 {dimension_numbers = #tpu.dot_dimension_numbers<[1], [0], [0], [1], [0, 0, 1, 1], [], []>} : vector<16x32xbf16>, vector<32x32xbf16>, vector<16x32xf32> -> vector<16x32xf32>
    %c0_55 = arith.constant 0 : index
    %c0_56 = arith.constant 0 : index
    %136 = vector.load %arg7[%c0_55, %c0_56] : memref<1x32xf32, #tpu.memory_space<vmem>>, vector<1x32xf32>
    %137 = vector.broadcast %136 : vector<1x32xf32> to vector<16x32xf32>
    %138 = arith.addf %135, %137 : vector<16x32xf32>
    %c0_57 = arith.constant 0 : index
    %c0_58 = arith.constant 0 : index
    %139 = vector.load %arg8[%c0_57, %c0_58] : memref<1x32xf32, #tpu.memory_space<vmem>>, vector<1x32xf32>
    %c0_59 = arith.constant 0 : index
    %c0_60 = arith.constant 0 : index
    %140 = vector.load %arg9[%c0_59, %c0_60] : memref<1x32xf32, #tpu.memory_space<vmem>>, vector<1x32xf32>
    %cst_61 = arith.constant dense<0.000000e+00> : vector<16xf32>
    %141 = vector.multi_reduction <add>, %138, %cst_61 [1] : vector<16x32xf32> to vector<16xf32>
    %142 = vector.shape_cast %141 : vector<16xf32> to vector<16x1xf32>
    %cst_62 = arith.constant 3.200000e+01 : f32
    %143 = vector.broadcast %cst_62 : f32 to vector<16x1xf32>
    %144 = arith.divf %142, %143 : vector<16x1xf32>
    %145 = vector.broadcast %144 : vector<16x1xf32> to vector<16x32xf32>
    %146 = arith.subf %138, %145 : vector<16x32xf32>
    %147 = arith.mulf %146, %146 : vector<16x32xf32>
    %cst_63 = arith.constant dense<0.000000e+00> : vector<16xf32>
    %148 = vector.multi_reduction <add>, %147, %cst_63 [1] : vector<16x32xf32> to vector<16xf32>
    %149 = vector.shape_cast %148 : vector<16xf32> to vector<16x1xf32>
    %cst_64 = arith.constant 3.200000e+01 : f32
    %150 = vector.broadcast %cst_64 : f32 to vector<16x1xf32>
    %151 = arith.divf %149, %150 : vector<16x1xf32>
    %152 = vector.broadcast %144 : vector<16x1xf32> to vector<16x32xf32>
    %153 = arith.subf %138, %152 : vector<16x32xf32>
    %cst_65 = arith.constant 9.99999974E-6 : f32
    %154 = vector.broadcast %cst_65 : f32 to vector<16x1xf32>
    %155 = arith.addf %151, %154 : vector<16x1xf32>
    %156 = math.rsqrt %155 : vector<16x1xf32>
    %157 = vector.broadcast %156 : vector<16x1xf32> to vector<16x32xf32>
    %158 = arith.mulf %153, %157 : vector<16x32xf32>
    %159 = vector.broadcast %139 : vector<1x32xf32> to vector<16x32xf32>
    %160 = arith.mulf %158, %159 : vector<16x32xf32>
    %161 = vector.broadcast %140 : vector<1x32xf32> to vector<16x32xf32>
    %162 = arith.addf %160, %161 : vector<16x32xf32>
    %163 = arith.truncf %162 : vector<16x32xf32> to vector<16x32xbf16>
    %c0_66 = arith.constant 0 : index
    %c0_67 = arith.constant 0 : index
    %164 = vector.load %arg10[%c0_66, %c0_67] : memref<32x128xbf16, #tpu.memory_space<vmem>>, vector<32x128xbf16>
    %cst_68 = arith.constant dense<0.000000e+00> : vector<16x128xf32>
    %165 = tpu.matmul %163, %164, %cst_68 {dimension_numbers = #tpu.dot_dimension_numbers<[1], [0], [0], [1], [0, 0, 1, 1], [], []>} : vector<16x32xbf16>, vector<32x128xbf16>, vector<16x128xf32> -> vector<16x128xf32>
    %c0_69 = arith.constant 0 : index
    %c0_70 = arith.constant 0 : index
    %166 = vector.load %arg11[%c0_69, %c0_70] : memref<1x128xf32, #tpu.memory_space<vmem>>, vector<1x128xf32>
    %167 = vector.broadcast %166 : vector<1x128xf32> to vector<16x128xf32>
    %168 = arith.addf %165, %167 : vector<16x128xf32>
    %cst_71 = arith.constant 5.000000e-01 : f32
    %169 = vector.broadcast %cst_71 : f32 to vector<16x128xf32>
    %170 = arith.mulf %169, %168 : vector<16x128xf32>
    %cst_72 = arith.constant 0.707106769 : f32
    %171 = vector.broadcast %cst_72 : f32 to vector<16x128xf32>
    %172 = arith.mulf %168, %171 : vector<16x128xf32>
    %173 = math.erf %172 : vector<16x128xf32>
    %cst_73 = arith.constant 1.000000e+00 : f32
    %174 = vector.broadcast %cst_73 : f32 to vector<16x128xf32>
    %175 = arith.addf %174, %173 : vector<16x128xf32>
    %176 = arith.mulf %170, %175 : vector<16x128xf32>
    %177 = arith.truncf %176 : vector<16x128xf32> to vector<16x128xbf16>
    %c0_74 = arith.constant 0 : index
    %c0_75 = arith.constant 0 : index
    %178 = vector.load %arg12[%c0_74, %c0_75] : memref<128x32xbf16, #tpu.memory_space<vmem>>, vector<128x32xbf16>
    %cst_76 = arith.constant dense<0.000000e+00> : vector<16x32xf32>
    %179 = tpu.matmul %177, %178, %cst_76 {dimension_numbers = #tpu.dot_dimension_numbers<[1], [0], [0], [1], [0, 0, 1, 1], [], []>} : vector<16x128xbf16>, vector<128x32xbf16>, vector<16x32xf32> -> vector<16x32xf32>
    %c0_77 = arith.constant 0 : index
    %c0_78 = arith.constant 0 : index
    %180 = vector.load %arg13[%c0_77, %c0_78] : memref<1x32xf32, #tpu.memory_space<vmem>>, vector<1x32xf32>
    %181 = vector.broadcast %180 : vector<1x32xf32> to vector<16x32xf32>
    %182 = arith.addf %179, %181 : vector<16x32xf32>
    %183 = arith.addf %138, %138 : vector<16x32xf32>
    %184 = arith.addf %183, %182 : vector<16x32xf32>
    %c0_79 = arith.constant 0 : index
    %c0_80 = arith.constant 0 : index
    %185 = vector.load %arg14[%c0_79, %c0_80] : memref<16x32xf32, #tpu.memory_space<vmem>>, vector<16x32xf32>
    tpu.vector_store %arg14[%c0_79, %c0_80], %184 {strides = array<i32>} : memref<16x32xf32, #tpu.memory_space<vmem>>, vector<16x32xf32>,
    return
  }
  func.func @transform_0(%arg0: i32) -> (i32, i32) {
    %c0_i32 = arith.constant 0 : i32
    %c0_i32_0 = arith.constant 0 : i32
    return %arg0, %c0_i32 : i32, i32
  }
  func.func @transform_1(%arg0: i32) -> (i32, i32) {
    %c0_i32 = arith.constant 0 : i32
    %c0_i32_0 = arith.constant 0 : i32
    %c0_i32_1 = arith.constant 0 : i32
    return %c0_i32, %c0_i32_0 : i32, i32
  }
  func.func @transform_2(%arg0: i32) -> (i32, i32) {
    %c0_i32 = arith.constant 0 : i32
    %c0_i32_0 = arith.constant 0 : i32
    %c0_i32_1 = arith.constant 0 : i32
    return %c0_i32, %c0_i32_0 : i32, i32
  }
  func.func @transform_3(%arg0: i32) -> (i32, i32) {
    %c0_i32 = arith.constant 0 : i32
    %c0_i32_0 = arith.constant 0 : i32
    %c0_i32_1 = arith.constant 0 : i32
    return %c0_i32, %c0_i32_0 : i32, i32
  }
  func.func @transform_4(%arg0: i32) -> (i32, i32) {
    %c0_i32 = arith.constant 0 : i32
    %c0_i32_0 = arith.constant 0 : i32
    %c0_i32_1 = arith.constant 0 : i32
    return %c0_i32, %c0_i32_0 : i32, i32
  }
  func.func @transform_5(%arg0: i32) -> (i32, i32) {
    %c0_i32 = arith.constant 0 : i32
    %c0_i32_0 = arith.constant 0 : i32
    %c0_i32_1 = arith.constant 0 : i32
    return %c0_i32, %c0_i32_0 : i32, i32
  }
  func.func @transform_6(%arg0: i32) -> (i32, i32) {
    %c0_i32 = arith.constant 0 : i32
    %c0_i32_0 = arith.constant 0 : i32
    %c0_i32_1 = arith.constant 0 : i32
    return %c0_i32, %c0_i32_0 : i32, i32
  }
  func.func @transform_7(%arg0: i32) -> (i32, i32) {
    %c0_i32 = arith.constant 0 : i32
    %c0_i32_0 = arith.constant 0 : i32
    %c0_i32_1 = arith.constant 0 : i32
    return %c0_i32, %c0_i32_0 : i32, i32
  }
  func.func @transform_8(%arg0: i32) -> (i32, i32) {
    %c0_i32 = arith.constant 0 : i32
    %c0_i32_0 = arith.constant 0 : i32
    %c0_i32_1 = arith.constant 0 : i32
    return %c0_i32, %c0_i32_0 : i32, i32
  }
  func.func @transform_9(%arg0: i32) -> (i32, i32) {
    %c0_i32 = arith.constant 0 : i32
    %c0_i32_0 = arith.constant 0 : i32
    %c0_i32_1 = arith.constant 0 : i32
    return %c0_i32, %c0_i32_0 : i32, i32
  }
  func.func @transform_10(%arg0: i32) -> (i32, i32) {
    %c0_i32 = arith.constant 0 : i32
    %c0_i32_0 = arith.constant 0 : i32
    %c0_i32_1 = arith.constant 0 : i32
    return %c0_i32, %c0_i32_0 : i32, i32
  }
  func.func @transform_11(%arg0: i32) -> (i32, i32) {
    %c0_i32 = arith.constant 0 : i32
    %c0_i32_0 = arith.constant 0 : i32
    %c0_i32_1 = arith.constant 0 : i32
    return %c0_i32, %c0_i32_0 : i32, i32
  }
  func.func @transform_12(%arg0: i32) -> (i32, i32) {
    %c0_i32 = arith.constant 0 : i32
    %c0_i32_0 = arith.constant 0 : i32
    %c0_i32_1 = arith.constant 0 : i32
    return %c0_i32, %c0_i32_0 : i32, i32
  }
  func.func @transform_13(%arg0: i32) -> (i32, i32) {
    %c0_i32 = arith.constant 0 : i32
    %c0_i32_0 = arith.constant 0 : i32
    return %arg0, %c0_i32 : i32, i32
  }
}

</mosaic_0001>

<bundles_post_ra>
// kernel: tpu_custom_call.1
= control target key start
LH: loop header
LB: loop body
LE: loop exit
PB: predicated region body
PF: predicated region fallthrough
CT: control target
= control target key end

     0   :  { %vm50_vm0 = vcmask 261120   ;;  %s1656_s0 = inlined_call_operand.vmem [shape: f32[16,32], index: 0, kind: input, shape index: {}]   ;;  %s1657_s1 = inlined_call_operand.vmem [shape: f32[1,32], index: 1, kind: input, shape index: {}]   ;;  %s1658_s2 = inlined_call_operand.vmem [shape: f32[1,32], index: 2, kind: input, shape index: {}]   ;;  %s1659_s3 = inlined_call_operand.vmem [shape: bf16[32,96], index: 3, kind: input, shape index: {}]   ;;  %s1660_s4 = inlined_call_operand.vmem [shape: f32[1,96], index: 4, kind: input, shape index: {}]   ;;  %s1661_s5 = inlined_call_operand.vmem [shape: bf16[32,32], index: 5, kind: input, shape index: {}]   ;;  %s1662_s6 = inlined_call_operand.vmem [shape: f32[1,32], index: 6, kind: input, shape index: {}]   ;;  %s1663_s7 = inlined_call_operand.vmem [shape: f32[1,32], index: 7, kind: input, shape index: {}]   ;;  %s1664_s8 = inlined_call_operand.vmem [shape: f32[1,32], index: 8, kind: input, shape index: {}]   ;;  %s1665_s9 = inlined_call_operand.vmem [shape: bf16[32,128], index: 9, kind: input, shape index: {}]   ;;  %s1666_s10 = inlined_call_operand.vmem [shape: f32[1,128], index: 10, kind: input, shape index: {}]   ;;  %s1667_s11 = inlined_call_operand.vmem [shape: bf16[128,32], index: 11, kind: input, shape index: {}]   ;;  %s1668_s12 = inlined_call_operand.vmem [shape: f32[1,32], index: 12, kind: input, shape index: {}]   ;;  %s1669_s13 = inlined_call_operand.hbm [shape: f32[16,32], index: 13, kind: output, shape index: {}]  }
   0x1   :  { %v46_v0 = vld [vmem:[%s1656_s0] sm:$0xff] }
   0x2   :  { %v51_v1 = vsel %vm50_vm0, %v46_v0, 0.0 }
   0x3   :  { %52 = vadd.xlane.f32.xlu0 %v51_v1 }
   0x4   :  { %18 = vsyncpa [#allocation4], 0  ;;  %v47_v2 = vld [vmem:[%s1656_s0 + $0x8] sm:$0xff]  ;;  %v1301_v4 = vmov 32.0   ;;  %v1175_v23 = vld [vmem:[%s1659_s3] sm:$0xff]  ;;  %s1304_s20 = smov 96  }
   0x5   :  { %v54_v3 = vsel %vm50_vm0, %v47_v2, 0.0  ;;  %1229 = vrcp.f32 %v1301_v4  ;;  %v1176_v21 = vld [vmem:[%s1659_s3 + $0x8] sm:$0xff]  ;;  %v1221_v42 = vld [vmem:[%s1657_s1] ss:$0 sm:$0xff]  ;;  %s1302_s1 = smov 120   ;;  %s1306_s21 = smov 80  }
   0x6   :  { %142 = vmatpush.bf16.msra.mxu0 %v1176_v21  ;;  %v1222_v47 = vld [vmem:[%s1658_s2] ss:$0 sm:$0xff]  ;;  %s1303_s2 = smov 88   ;;  %s1307_s22 = smov 104   ;;  %vm157_vm8 = vcmask 64512   ;;  %vm258_vm9 = vcmask 1043456  }
   0x7   :  { %v1223_v52 = vld [vmem:[%s1660_s4] ss:$0 sm:$0xff]  ;;  %s1305_s4 = smov 112   ;;  %s1308_s23 = smov 72  }
   0x8   :  { %s1309_s24 = smov 64   ;;  %s1310_s25 = smov 56  }
   0x9   :  { %s1311_s26 = smov 48   ;;  %s1312_s27 = smov 40  }
   0xa   :  { %143 = vmatpush.bf16.msra.mxu0 %v1175_v23  ;;  %s1313_s28 = smov 24   ;;  %s1314_s0 = smov 16  }
   0xb   :  { %55 = vadd.xlane.f32.xlu0 %v54_v3  ;;  %v1230_v5 = vpop.eup %1229  ;;  %s1315_s29 = smov 8   ;;  %s1086_s18 = sshll.u32 %s1669_s13, 4  ;;  %s1087_s18 = int_to_ptr.hbm [resolvable:$true] %s1086_s18 }
   0xc   :  { %v58_v6 = vmul.f32 32.0, %v1230_v5  ;;  %vm62_vm1 = vweird.f32 %v1230_v5  ;;  %s1316_s19 = smov [#allocation3]  }
   0xe   :  { %v59_v7 = vsub.f32 1.0, %v58_v6 }
  0x10   :  { %v60_v8 = vmul.f32 %v1230_v5, %v59_v7 }
  0x12   :  { %v61_v9 = vadd.f32 %v1230_v5, %v60_v8 }
  0x14   :  { %v1396_v10 = vsel %vm62_vm1, %v1230_v5, %v61_v9 }
  0x76   :  { %v53_v11 = vpop.xlane.xlu0 %52 }
  0x77   :  { %v64_v12 = vmul.f32 %v1396_v10, %v53_v11 }
  0x79   :  { %v66_v13 = vsub.f32 %v46_v0, %v64_v12 }
  0x7b   :  { %v68_v14 = vmul.f32 %v66_v13, %v66_v13 }
  0x7d   :  { %v70_v15 = vsel %vm50_vm0, %v68_v14, 0.0 }
  0x7e   :  { %71 = vadd.xlane.f32.xlu1 %v70_v15  ;;  %v56_v16 = vpop.xlane.xlu0 %55 }
  0x7f   :  { %v65_v17 = vmul.f32 %v1396_v10, %v56_v16 }
  0x81   :  { %v67_v18 = vsub.f32 %v47_v2, %v65_v17 }
  0x83   :  { %v69_v19 = vmul.f32 %v67_v18, %v67_v18 }
  0x85   :  { %v73_v20 = vsel %vm50_vm0, %v69_v19, 0.0 }
  0x86   :  { %74 = vadd.xlane.f32.xlu1 %v73_v20 }
  0xf1   :  { %v72_v22 = vpop.xlane.xlu1 %71 }
  0xf2   :  { %v76_v24 = vmul.f32 %v72_v22, %v1396_v10 }
  0xf4   :  { %v78_v25 = vadd.f32 1e-05, %v76_v24 }
  0xf6   :  { %1231 = vrsqrt.f32 %v78_v25  ;;  %vm86_vm3 = vweird.f32 %v78_v25 }
  0xf9   :  { %v75_v26 = vpop.xlane.xlu1 %74 }
  0xfa   :  { %v77_v27 = vmul.f32 %v75_v26, %v1396_v10 }
  0xfc   :  { %v1232_v28 = vpop.eup %1231  ;;  %v79_v29 = vadd.f32 1e-05, %v77_v27 }
  0xfd   :  { %v81_v30 = vmul.f32 %v1232_v28, %v78_v25  ;;  %vm87_vm2 = vweird.f32 %v1232_v28 }
  0xfe   :  { %1233 = vrsqrt.f32 %v79_v29  ;;  %vm88_vm4 = vmor %vm86_vm3, %vm87_vm2  ;;  %vm96_vm6 = vweird.f32 %v79_v29 }
  0xff   :  { %v82_v31 = vmul.f32 %v1232_v28, %v81_v30 }
 0x101   :  { %v83_v32 = vmul.f32 0.5, %v82_v31 }
 0x103   :  { %v84_v33 = vsub.f32 1.5, %v83_v32 }
 0x104   :  { %v1234_v34 = vpop.eup %1233 }
 0x105   :  { %v85_v35 = vmul.f32 %v1232_v28, %v84_v33  ;;  %v91_v36 = vmul.f32 %v1234_v34, %v79_v29  ;;  %vm97_vm5 = vweird.f32 %v1234_v34 }
 0x106   :  { %vm98_vm7 = vmor %vm96_vm6, %vm97_vm5 }
 0x107   :  { %v92_v37 = vmul.f32 %v1234_v34, %v91_v36  ;;  %v89_v38 = vsel %vm88_vm4, %v1232_v28, %v85_v35 }
 0x108   :  { %v100_v41 = vmul.f32 %v89_v38, %v66_v13 }
 0x109   :  { %v93_v39 = vmul.f32 0.5, %v92_v37 }
 0x10a   :  { %v105_v46 = vmul.f32 %v1221_v42, %v100_v41 }
 0x10b   :  { %v94_v40 = vsub.f32 1.5, %v93_v39 }
 0x10c   :  { %v110_v49 = vadd.f32 %v1222_v47, %v105_v46 }
 0x10d   :  { %v95_v43 = vmul.f32 %v1234_v34, %v94_v40 }
 0x10f   :  { %v99_v44 = vsel %vm98_vm7, %v1234_v34, %v95_v43 }
 0x110   :  { %v101_v45 = vmul.f32 %v99_v44, %v67_v18 }
 0x112   :  { %v106_v48 = vmul.f32 %v1221_v42, %v101_v45 }
 0x114   :  { %v111_v50 = vadd.f32 %v1222_v47, %v106_v48 }
 0x116   :  { %v112_v51 = vpack.c.bf16 %v111_v50, %v110_v49 }
 0x118   :  { %1106 = vmatmul.msk.bf16.vlgmr.msra.gmra.mxu0 %vm50_vm0, %v112_v51 }
 0x195   :  { %v145_v53 = vpop.f32.mrf.mxu0 }
 0x196   :  { %v146_v54 = vadd.f32 %v1223_v52, %v145_v53 }
 0x198   :  { %v150_v55 = vpack.c.bf16 %v146_v54, %v146_v54 }
 0x19a   :  { %v153_v56 = vunpack.c.l.b16 %v150_v55 }
 0x19c   :  { %v1420_v57 = vpack.c.b16 %v153_v56, %v153_v56 }
 0x19d   :  { %v147_v58 = vpop.f32.mrf.mxu0 }
 0x19e   :  { %v148_v59 = vadd.f32 %v1223_v52, %v147_v58  ;;  %298 = vrot.lane.b32.xlu1 %v1420_v57, %s1302_s1  ;;  %300 = vrot.lane.b32.xlu0 %v1420_v57, %s1303_s2 }
 0x19f   :  { %155 = vrot.lane.b32.xlu2 %v1420_v57, %s1304_s20 }
 0x1a0   :  { %v151_v60 = vpack.c.bf16 %v148_v59, %v148_v59 }
 0x1a2   :  { %v178_v61 = vunpack.c.l.b16 %v151_v60 }
 0x1a4   :  { %v1425_v62 = vpack.c.b16 %v178_v61, %v178_v61 }
 0x1a6   :  { %463 = vrot.lane.b32.xlu1 %v1425_v62, %s1305_s4  ;;  %465 = vrot.lane.b32.xlu0 %v1425_v62, %s1306_s21 }
 0x1a7   :  { %180 = vrot.lane.b32.xlu2 %v1425_v62, %s1304_s20 }
 0x1ae   :  { %582 = vrot.lane.b32.xlu1 %v1420_v57, %s1307_s22  ;;  %584 = vrot.lane.b32.xlu0 %v1420_v57, %s1308_s23 }
 0x1af   :  { %323 = vrot.lane.b32.xlu2 %v1425_v62, %s1303_s2 }
 0x1b6   :  { %605 = vrot.lane.b32.xlu0 %v1425_v62, %s1307_s22 }
 0x1b7   :  { %321 = vrot.lane.b32.xlu2 %v1425_v62, %s1302_s1 }
 0x1be   :  { %253 = vrot.lane.b32.xlu0 %v1420_v57, %s1309_s24 }
 0x1bf   :  { %442 = vrot.lane.b32.xlu2 %v1420_v57, %s1306_s21 }
 0x1c7   :  { %440 = vrot.lane.b32.xlu2 %v1420_v57, %s1305_s4 }
 0x1cf   :  { %607 = vrot.lane.b32.xlu2 %v1425_v62, %s1308_s23 }
 0x1f9   :  { %v156_v63 = vpop.permute.xlu2 %155 }
 0x1fa   :  { %v162_v0 = vsel %vm157_vm8, %v156_v63, 0 }
 0x1fb   :  { %171 = vmatpush.bf16.xpose.msra.mxu1 %v162_v0 }
 0x201   :  { %v181_v1 = vpop.permute.xlu2 %180 }
 0x202   :  { %1107 = vmatmul.msk.bf16.vlgmr.msra.gmra.mxu1 %vm157_vm8, %v150_v55  ;;  %v186_v2 = vsel %vm157_vm8, %v181_v1, 0 }
 0x203   :  { %195 = vmatpush.bf16.xpose.msra.mxu2 %v186_v2 }
 0x209   :  { %v324_v3 = vpop.permute.xlu2 %323 }
 0x20a   :  { %1108 = vmatmul.msk.bf16.vlgmr.msra.gmra.mxu2 %vm157_vm8, %v151_v60  ;;  %v329_v4 = vsel %vm157_vm8, %v324_v3, 0 }
 0x20b   :  { %338 = vmatpush.bf16.xpose.msrb.mxu1 %v329_v4 }
 0x210   :  { %v301_v5 = vpop.permute.xlu0 %300  ;;  %v299_v8 = vpop.permute.xlu1 %298 }
 0x211   :  { %v322_v6 = vpop.permute.xlu2 %321  ;;  %v306_v7 = vsel %vm157_vm8, %v301_v5, 0 }
 0x212   :  { %1112 = vmatmul.msk.bf16.vlgmr.msrb.gmra.mxu1 %vm157_vm8, %v322_v6  ;;  %315 = vmatpush.bf16.xpose.msrb.mxu0 %v306_v7 }
 0x218   :  { %v466_v9 = vpop.permute.xlu0 %465  ;;  %v464_v15 = vpop.permute.xlu1 %463 }
 0x219   :  { %v471_v11 = vsel %vm157_vm8, %v466_v9, 0  ;;  %v443_v12 = vpop.permute.xlu2 %442  ;;  %1111 = vmatmul.msk.bf16.vlgmr.msrb.gmra.mxu0 %vm157_vm8, %v299_v8 }
 0x21a   :  { %v448_v13 = vsel %vm157_vm8, %v443_v12, 0  ;;  %480 = vmatpush.bf16.xpose.msra.mxu1 %v471_v11 }
 0x21b   :  { %457 = vmatpush.bf16.xpose.msra.mxu0 %v448_v13 }
 0x220   :  { %v585_v14 = vpop.permute.xlu0 %584  ;;  %v583_v23 = vpop.permute.xlu1 %582 }
 0x221   :  { %v590_v16 = vsel %vm157_vm8, %v585_v14, 0  ;;  %v441_v17 = vpop.permute.xlu2 %440 }
 0x222   :  { %1116 = vmatmul.msk.bf16.vlgmr.msra.gmra.mxu1 %vm157_vm8, %v464_v15 }
 0x223   :  { %599 = vmatpush.bf16.xpose.msrb.mxu0 %v590_v16 }
 0x228   :  { %v606_v18 = vpop.permute.xlu0 %605 }
 0x229   :  { %v608_v19 = vpop.permute.xlu2 %607  ;;  %1115 = vmatmul.msk.bf16.vlgmr.msra.gmra.mxu0 %vm157_vm8, %v441_v17 }
 0x22a   :  { %v613_v20 = vsel %vm157_vm8, %v608_v19, 0 }
 0x22b   :  { %622 = vmatpush.bf16.xpose.msrb.mxu1 %v613_v20 }
 0x230   :  { %v254_v21 = vpop.permute.xlu0 %253 }
 0x231   :  { %v260_v22 = vsel %vm258_vm9, %v254_v21, 0 }
 0x232   :  { %1120 = vmatmul.msk.bf16.vlgmr.msrb.gmra.mxu1 %vm157_vm8, %v606_v18  ;;  %269 = vmatpush.bf16.msra.mxu3 %v260_v22 }
 0x239   :  { %1119 = vmatmul.msk.bf16.vlgmr.msrb.gmra.mxu0 %vm157_vm8, %v583_v23 }
 0x27f   :  { %v173_v24 = vpop.f32.mrf.mxu1 }
 0x280   :  { %v201_v25 = vsel %vm157_vm8, %v173_v24, -inf }
 0x281   :  { %202 = vmax.xlane.f32.xlu2 %v201_v25 }
 0x287   :  { %v175_v26 = vpop.f32.mrf.mxu1 }
 0x28d   :  { %v197_v27 = vpop.f32.mrf.mxu2 }
 0x28e   :  { %v204_v28 = vsel %vm157_vm8, %v197_v27, -inf }
 0x28f   :  { %205 = vmax.xlane.f32.xlu1 %v204_v28  ;;  %v340_v29 = vpop.f32.mrf.mxu1 }
 0x290   :  { %v347_v30 = vsel %vm157_vm8, %v340_v29, -inf }
 0x291   :  { %348 = vmax.xlane.f32.xlu2 %v347_v30 }
 0x295   :  { %v199_v31 = vpop.f32.mrf.mxu2 }
 0x296   :  { %v317_v32 = vpop.f32.mrf.mxu0 }
 0x297   :  { %v342_v33 = vpop.f32.mrf.mxu1  ;;  %v344_v34 = vsel %vm157_vm8, %v317_v32, -inf }
 0x298   :  { %345 = vmax.xlane.f32.xlu0 %v344_v34 }
 0x29e   :  { %v319_v35 = vpop.f32.mrf.mxu0 }
 0x29f   :  { %v482_v36 = vpop.f32.mrf.mxu1 }
 0x2a0   :  { %v489_v37 = vsel %vm157_vm8, %v482_v36, -inf }
 0x2a1   :  { %490 = vmax.xlane.f32.xlu2 %v489_v37 }
 0x2a6   :  { %v459_v38 = vpop.f32.mrf.mxu0 }
 0x2a7   :  { %v484_v39 = vpop.f32.mrf.mxu1  ;;  %v486_v40 = vsel %vm157_vm8, %v459_v38, -inf }
 0x2a8   :  { %487 = vmax.xlane.f32.xlu0 %v486_v40 }
 0x2ae   :  { %v461_v41 = vpop.f32.mrf.mxu0 }
 0x2af   :  { %v1463_v42 = vpop.f32.mrf.mxu1 }
 0x2b0   :  { %v631_v43 = vsel %vm157_vm8, %v1463_v42, -inf }
 0x2b1   :  { %632 = vmax.xlane.f32.xlu1 %v631_v43 }
 0x2b6   :  { %v601_v44 = vpop.f32.mrf.mxu0 }
 0x2b7   :  { %v626_v45 = vpop.f32.mrf.mxu1  ;;  %v628_v46 = vsel %vm157_vm8, %v601_v44, -inf }
 0x2b8   :  { %629 = vmax.xlane.f32.xlu2 %v628_v46 }
 0x2bc   :  { %396 = vrot.lane.b32.xlu0 %v1420_v57, %s1310_s25 }
 0x2be   :  { %v603_v47 = vpop.f32.mrf.mxu0 }
 0x2f4   :  { %v203_v48 = vpop.xlane.xlu2 %202 }
 0x2f5   :  { %v207_v49 = vsub.f32 %v173_v24, %v203_v48 }
 0x2f7   :  { %v209_v50 = vmul.f32 1.442695, %v207_v49 }
 0x2f9   :  { %1235 = vpow2.f32 %v209_v50 }
 0x2ff   :  { %v1470_v51 = vpop.eup %1235 }
 0x300   :  { %v213_v52 = vsel %vm157_vm8, %v1470_v51, 0.0 }
 0x301   :  { %214 = vadd.xlane.f32.xlu1 %v213_v52 }
 0x302   :  { %v206_v53 = vpop.xlane.xlu1 %205 }
 0x303   :  { %v208_v54 = vsub.f32 %v197_v27, %v206_v53 }
 0x304   :  { %v349_v56 = vpop.xlane.xlu2 %348 }
 0x305   :  { %v211_v55 = vmul.f32 1.442695, %v208_v54  ;;  %v351_v61 = vsub.f32 %v340_v29, %v349_v56 }
 0x307   :  { %1237 = vpow2.f32 %v211_v55  ;;  %v354_v1 = vmul.f32 1.442695, %v351_v61 }
 0x30b   :  { %v346_v58 = vpop.xlane.xlu0 %345 }
 0x30c   :  { %v350_v59 = vsub.f32 %v317_v32, %v346_v58 }
 0x30d   :  { %v1474_v60 = vpop.eup %1237 }
 0x30e   :  { %v352_v63 = vmul.f32 1.442695, %v350_v59  ;;  %v216_v0 = vsel %vm157_vm8, %v1474_v60, 0.0 }
 0x30f   :  { %217 = vadd.xlane.f32.xlu1 %v216_v0 }
 0x310   :  { %1239 = vpow2.f32 %v352_v63 }
 0x311   :  { %1241 = vpow2.f32 %v354_v1 }
 0x314   :  { %v491_v2 = vpop.xlane.xlu2 %490 }
 0x315   :  { %v493_v3 = vsub.f32 %v482_v36, %v491_v2 }
 0x316   :  { %v1478_v4 = vpop.eup %1239 }
 0x317   :  { %v496_v5 = vmul.f32 1.442695, %v493_v3  ;;  %v356_v6 = vsel %vm157_vm8, %v1478_v4, 0.0  ;;  %v1482_v8 = vpop.eup %1241 }
 0x318   :  { %357 = vadd.xlane.f32.xlu2 %v356_v6  ;;  %v359_v13 = vsel %vm157_vm8, %v1482_v8, 0.0 }
 0x319   :  { %1243 = vpow2.f32 %v496_v5 }
 0x31b   :  { %v488_v7 = vpop.xlane.xlu0 %487 }
 0x31c   :  { %v492_v9 = vsub.f32 %v459_v38, %v488_v7 }
 0x31e   :  { %v494_v11 = vmul.f32 1.442695, %v492_v9 }
 0x31f   :  { %v1484_v12 = vpop.eup %1243 }
 0x320   :  { %1245 = vpow2.f32 %v494_v11  ;;  %360 = vadd.xlane.f32.xlu2 %v359_v13  ;;  %v501_v14 = vsel %vm157_vm8, %v1484_v12, 0.0 }
 0x321   :  { %502 = vadd.xlane.f32.xlu0 %v501_v14 }
 0x324   :  { %v633_v22 = vpop.xlane.xlu1 %632 }
 0x325   :  { %v635_v23 = vsub.f32 %v1463_v42, %v633_v22 }
 0x326   :  { %v1490_v15 = vpop.eup %1245 }
 0x327   :  { %v498_v16 = vsel %vm157_vm8, %v1490_v15, 0.0  ;;  %v638_v24 = vmul.f32 1.442695, %v635_v23 }
 0x328   :  { %275 = vrot.lane.b32.xlu1 %v1425_v62, %s1309_s24  ;;  %499 = vadd.xlane.f32.xlu2 %v498_v16 }
 0x32b   :  { %v630_v17 = vpop.xlane.xlu2 %629 }
 0x32c   :  { %v634_v18 = vsub.f32 %v601_v44, %v630_v17 }
 0x32e   :  { %v636_v19 = vmul.f32 1.442695, %v634_v18  ;;  %v397_v53 = vpop.permute.xlu0 %396 }
 0x32f   :  { %v402_v63 = vsel %vm258_vm9, %v397_v53, 0 }
 0x330   :  { %1247 = vpow2.f32 %v636_v19 }
 0x331   :  { %1249 = vpow2.f32 %v638_v24 }
 0x335   :  { %538 = vrot.lane.b32.xlu0 %v1420_v57, %s1311_s26 }
 0x336   :  { %v1501_v20 = vpop.eup %1247 }
 0x337   :  { %v640_v21 = vsel %vm157_vm8, %v1501_v20, 0.0 }
 0x33d   :  { %680 = vrot.lane.b32.xlu0 %v1420_v57, %s1312_s27  ;;  %v1506_v57 = vpop.eup %1249 }
 0x33e   :  { %v643_v25 = vsel %vm157_vm8, %v1506_v57, 0.0 }
 0x340   :  { %417 = vrot.lane.b32.xlu2 %v1425_v62, %s1310_s25 }
 0x345   :  { %701 = vrot.lane.b32.xlu0 %v1425_v62, %s1312_s27 }
 0x352   :  { %641 = vadd.xlane.f32.xlu1 %v640_v21 }
 0x369   :  { %644 = vadd.xlane.f32.xlu2 %v643_v25 }
 0x36b   :  { %559 = vrot.lane.b32.xlu1 %v1425_v62, %s1311_s26 }
 0x374   :  { %v215_v26 = vpop.xlane.xlu1 %214 }
 0x375   :  { %1251 = vrcp.f32 %v215_v26  ;;  %v230_v30 = vand.u32 2147483648, %v215_v26  ;;  %v228_v32 = vand.u32 2147483647, %v215_v26  ;;  %vm224_vm11 = vweird.f32 %v215_v26 }
 0x377   :  { %v231_v35 = vor.u32 1.1754944e-38, %v230_v30  ;;  %vm229_vm13 = vcmp.eq.f32.partialorder %v228_v32, 8.507059e+37 }
 0x37b   :  { %v1252_v27 = vpop.eup %1251 }
 0x37c   :  { %v220_v28 = vmul.f32 %v1252_v27, %v215_v26  ;;  %vm225_vm10 = vweird.f32 %v1252_v27 }
 0x37d   :  { %vm226_vm12 = vmor %vm224_vm11, %vm225_vm10 }
 0x37e   :  { %v221_v29 = vsub.f32 1.0, %v220_v28 }
 0x380   :  { %v222_v31 = vmul.f32 %v1252_v27, %v221_v29 }
 0x382   :  { %v218_v33 = vpop.xlane.xlu1 %217  ;;  %v223_v34 = vadd.f32 %v1252_v27, %v222_v31 }
 0x383   :  { %1253 = vrcp.f32 %v218_v33  ;;  %v245_v45 = vand.u32 2147483648, %v218_v33  ;;  %vm239_vm15 = vweird.f32 %v218_v33  ;;  %v243_v46 = vand.u32 2147483647, %v218_v33 }
 0x384   :  { %v227_v36 = vsel %vm226_vm12, %v1252_v27, %v223_v34 }
 0x385   :  { %v232_v37 = vsel %vm229_vm13, %v231_v35, %v227_v36  ;;  %vm244_vm2 = vcmp.eq.f32.partialorder %v243_v46, 8.507059e+37 }
 0x386   :  { %v249_v62 = vmul.f32 %v1470_v51, %v232_v37  ;;  %v246_v51 = vor.u32 1.1754944e-38, %v245_v45 }
 0x388   :  { %v251_v38 = vpack.c.bf16 %v249_v62, %v249_v62 }
 0x389   :  { %v1254_v39 = vpop.eup %1253 }
 0x38a   :  { %v235_v40 = vmul.f32 %v1254_v39, %v218_v33  ;;  %1109 = vmatmul.msk.bf16.vlgmr.msra.gmra.mxu3 %vm157_vm8, %v251_v38  ;;  %vm240_vm14 = vweird.f32 %v1254_v39 }
 0x38b   :  { %v358_v41 = vpop.xlane.xlu2 %357  ;;  %vm241_vm1 = vmor %vm239_vm15, %vm240_vm14 }
 0x38c   :  { %v236_v42 = vsub.f32 1.0, %v235_v40  ;;  %1255 = vrcp.f32 %v358_v41  ;;  %v373_v3 = vand.u32 2147483648, %v358_v41  ;;  %vm367_vm4 = vweird.f32 %v358_v41 }
 0x38d   :  { %v371_v5 = vand.u32 2147483647, %v358_v41 }
 0x38e   :  { %v237_v43 = vmul.f32 %v1254_v39, %v236_v42  ;;  %v374_v14 = vor.u32 1.1754944e-38, %v373_v3 }
 0x38f   :  { %vm372_vm6 = vcmp.eq.f32.partialorder %v371_v5, 8.507059e+37 }
 0x390   :  { %v238_v44 = vadd.f32 %v1254_v39, %v237_v43 }
 0x392   :  { %v1256_v47 = vpop.eup %1255  ;;  %v242_v50 = vsel %vm241_vm1, %v1254_v39, %v238_v44 }
 0x393   :  { %v363_v48 = vmul.f32 %v1256_v47, %v358_v41  ;;  %v1513_v49 = vpop.xlane.xlu2 %360  ;;  %v247_v52 = vsel %vm244_vm2, %v246_v51, %v242_v50  ;;  %vm368_vm3 = vweird.f32 %v1256_v47 }
 0x394   :  { %v250_v55 = vmul.f32 %v1474_v60, %v247_v52  ;;  %1257 = vrcp.f32 %v1513_v49  ;;  %v1519_v2 = vpop.xlane.xlu0 %502  ;;  %vm369_vm5 = vmor %vm367_vm4, %vm368_vm3  ;;  %vm382_vm14 = vweird.f32 %v1513_v49  ;;  %v386_v62 = vand.u32 2147483647, %v1513_v49 }
 0x395   :  { %v364_v54 = vsub.f32 1.0, %v363_v48  ;;  %v530_v53 = vand.u32 2147483648, %v1519_v2 }
 0x396   :  { %v252_v0 = vpack.c.bf16 %v250_v55, %v250_v55  ;;  %vm387_vm1 = vcmp.eq.f32.partialorder %v386_v62, 8.507059e+37  ;;  %v528_v55 = vand.u32 2147483647, %v1519_v2 }
 0x397   :  { %v365_v58 = vmul.f32 %v1256_v47, %v364_v54 }
 0x399   :  { %v366_v1 = vadd.f32 %v1256_v47, %v365_v58 }
 0x39a   :  { %v276_v56 = vpop.permute.xlu1 %275  ;;  %v1258_v60 = vpop.eup %1257 }
 0x39b   :  { %v281_v59 = vsel %vm258_vm9, %v276_v56, 0  ;;  %v500_v61 = vpop.xlane.xlu2 %499  ;;  %v370_v7 = vsel %vm369_vm5, %v1256_v47, %v366_v1  ;;  %v378_v9 = vmul.f32 %v1258_v60, %v1513_v49  ;;  %vm383_vm13 = vweird.f32 %v1258_v60 }
 0x39c   :  { %290 = vmatpush.bf16.msrb.mxu3 %v281_v59  ;;  %1259 = vrcp.f32 %v500_v61  ;;  %v375_v18 = vsel %vm372_vm6, %v374_v14, %v370_v7  ;;  %v515_v19 = vand.u32 2147483648, %v500_v61  ;;  %v513_v23 = vand.u32 2147483647, %v500_v61  ;;  %vm384_vm15 = vmor %vm382_vm14, %vm383_vm13 }
 0x39d   :  { %v379_v21 = vsub.f32 1.0, %v378_v9  ;;  %v392_v26 = vmul.f32 %v1478_v4, %v375_v18  ;;  %vm509_vm10 = vweird.f32 %v500_v61  ;;  %v388_v4 = vand.u32 2147483648, %v1513_v49 }
 0x39e   :  { %v516_v28 = vor.u32 1.1754944e-38, %v515_v19  ;;  %vm514_vm12 = vcmp.eq.f32.partialorder %v513_v23, 8.507059e+37  ;;  %1261 = vrcp.f32 %v1519_v2  ;;  %vm524_vm5 = vweird.f32 %v1519_v2 }
 0x39f   :  { %1110 = vmatmul.msk.bf16.vlgmr.msrb.gmra.mxu3 %vm157_vm8, %v252_v0  ;;  %v380_v29 = vmul.f32 %v1258_v60, %v379_v21  ;;  %v394_v32 = vpack.c.bf16 %v392_v26, %v392_v26 }
 0x3a0   :  { %411 = vmatpush.bf16.msra.mxu3 %v402_v63  ;;  %v531_v63 = vor.u32 1.1754944e-38, %v530_v53 }
 0x3a1   :  { %v381_v34 = vadd.f32 %v1258_v60, %v380_v29 }
 0x3a2   :  { %v1260_v6 = vpop.eup %1259 }
 0x3a3   :  { %v505_v11 = vmul.f32 %v1260_v6, %v500_v61  ;;  %v418_v13 = vpop.permute.xlu2 %417  ;;  %vm510_vm7 = vweird.f32 %v1260_v6  ;;  %v385_v38 = vsel %vm384_vm15, %v1258_v60, %v381_v34 }
 0x3a4   :  { %v423_v16 = vsel %vm258_vm9, %v418_v13, 0  ;;  %vm511_vm11 = vmor %vm509_vm10, %vm510_vm7  ;;  %v1262_v42 = vpop.eup %1261 }
 0x3a5   :  { %v506_v17 = vsub.f32 1.0, %v505_v11  ;;  %432 = vmatpush.bf16.msrb.mxu3 %v423_v16  ;;  %v520_v44 = vmul.f32 %v1262_v42, %v1519_v2  ;;  %vm525_vm3 = vweird.f32 %v1262_v42 }
 0x3a6   :  { %vm526_vm7 = vmor %vm524_vm5, %vm525_vm3 }
 0x3a7   :  { %v507_v22 = vmul.f32 %v1260_v6, %v506_v17  ;;  %v539_v24 = vpop.permute.xlu0 %538  ;;  %v521_v45 = vsub.f32 1.0, %v520_v44 }
 0x3a8   :  { %v544_v25 = vsel %vm258_vm9, %v539_v24, 0 }
 0x3a9   :  { %v508_v27 = vadd.f32 %v1260_v6, %v507_v22  ;;  %553 = vmatpush.bf16.msrb.mxu2 %v544_v25  ;;  %v522_v48 = vmul.f32 %v1262_v42, %v521_v45 }
 0x3ab   :  { %v512_v30 = vsel %vm511_vm11, %v1260_v6, %v508_v27  ;;  %vm529_vm11 = vcmp.eq.f32.partialorder %v528_v55, 8.507059e+37 }
 0x3ac   :  { %v517_v31 = vsel %vm514_vm12, %v516_v28, %v512_v30 }
 0x3ad   :  { %v534_v33 = vmul.f32 %v1490_v15, %v517_v31  ;;  %v389_v15 = vor.u32 1.1754944e-38, %v388_v4 }
 0x3af   :  { %v681_v35 = vpop.permute.xlu0 %680  ;;  %1113 = vmatmul.msk.bf16.vlgmr.msra.gmra.mxu3 %vm157_vm8, %v394_v32  ;;  %v536_v36 = vpack.c.bf16 %v534_v33, %v534_v33  ;;  %v390_v39 = vsel %vm387_vm1, %v389_v15, %v385_v38  ;;  %vm768_vm1 = vcmask 195584  }
 0x3b0   :  { %v686_v37 = vsel %vm258_vm9, %v681_v35, 0  ;;  %v393_v40 = vmul.f32 %v1482_v8, %v390_v39  ;;  %v523_v8 = vadd.f32 %v1262_v42, %v522_v48 }
 0x3b1   :  { %695 = vmatpush.bf16.msra.mxu2 %v686_v37 }
 0x3b2   :  { %1117 = vmatmul.msk.bf16.vlgmr.msrb.gmra.mxu2 %vm157_vm8, %v536_v36  ;;  %v395_v41 = vpack.c.bf16 %v393_v40, %v393_v40  ;;  %v527_v59 = vsel %vm526_vm7, %v1262_v42, %v523_v8 }
 0x3b3   :  { %v532_v1 = vsel %vm529_vm11, %v531_v63, %v527_v59 }
 0x3b4   :  { %v535_v3 = vmul.f32 %v1484_v12, %v532_v1 }
 0x3b6   :  { %v537_v11 = vpack.c.bf16 %v535_v3, %v535_v3 }
 0x3b7   :  { %v702_v5 = vpop.permute.xlu0 %701 }
 0x3b8   :  { %v707_v9 = vsel %vm258_vm9, %v702_v5, 0  ;;  %v1224_v5 = vld [vmem:[%s1662_s6] ss:$0 sm:$0xff] }
 0x3bf   :  { %1114 = vmatmul.msk.bf16.vlgmr.msrb.gmra.mxu3 %vm157_vm8, %v395_v41 }
 0x3c5   :  { %v642_v43 = vpop.xlane.xlu1 %641 }
 0x3c6   :  { %1263 = vrcp.f32 %v642_v43  ;;  %v657_v50 = vand.u32 2147483648, %v642_v43  ;;  %v655_v52 = vand.u32 2147483647, %v642_v43  ;;  %vm651_vm4 = vweird.f32 %v642_v43 }
 0x3c8   :  { %v658_v56 = vor.u32 1.1754944e-38, %v657_v50  ;;  %vm656_vm10 = vcmp.eq.f32.partialorder %v655_v52, 8.507059e+37 }
 0x3cc   :  { %v1264_v46 = vpop.eup %1263 }
 0x3cd   :  { %v647_v47 = vmul.f32 %v1264_v46, %v642_v43  ;;  %vm652_vm2 = vweird.f32 %v1264_v46 }
 0x3ce   :  { %vm653_vm6 = vmor %vm651_vm4, %vm652_vm2 }
 0x3cf   :  { %v648_v49 = vsub.f32 1.0, %v647_v47  ;;  %v1177_v47 = vld [vmem:[%s1661_s5] sm:$0xff] }
 0x3d1   :  { %v649_v51 = vmul.f32 %v1264_v46, %v648_v49 }
 0x3d3   :  { %v650_v54 = vadd.f32 %v1264_v46, %v649_v51 }
 0x3d5   :  { %v654_v58 = vsel %vm653_vm6, %v1264_v46, %v650_v54  ;;  %v1178_v46 = vld [vmem:[%s1661_s5 + $0x8] sm:$0xff] }
 0x3d6   :  { %v659_v61 = vsel %vm656_vm10, %v658_v56, %v654_v58  ;;  %801 = vmatpush.bf16.msra.mxu0 %v1178_v46 }
 0x3d7   :  { %v676_v0 = vmul.f32 %v1501_v20, %v659_v61 }
 0x3d9   :  { %v678_v60 = vpack.c.bf16 %v676_v0, %v676_v0 }
 0x3da   :  { %802 = vmatpush.bf16.msra.mxu0 %v1177_v47 }
 0x3db   :  { %1121 = vmatmul.msk.bf16.vlgmr.msra.gmra.mxu2 %vm157_vm8, %v678_v60 }
 0x3dc   :  { %v645_v6 = vpop.xlane.xlu2 %644 }
 0x3dd   :  { %v560_v2 = vpop.permute.xlu1 %559  ;;  %1265 = vrcp.f32 %v645_v6  ;;  %v672_v16 = vand.u32 2147483648, %v645_v6  ;;  %v670_v12 = vand.u32 2147483647, %v645_v6  ;;  %vm666_vm13 = vweird.f32 %v645_v6 }
 0x3de   :  { %v565_v7 = vsel %vm258_vm9, %v560_v2, 0  ;;  %vm765_vm9 = vcmask 130048  }
 0x3df   :  { %574 = vmatpush.bf16.msra.mxu3 %v565_v7  ;;  %v673_v19 = vor.u32 1.1754944e-38, %v672_v16  ;;  %vm671_vm15 = vcmp.eq.f32.partialorder %v670_v12, 8.507059e+37 }
 0x3e2   :  { %1118 = vmatmul.msk.bf16.vlgmr.msra.gmra.mxu3 %vm157_vm8, %v537_v11 }
 0x3e3   :  { %716 = vmatpush.bf16.msrb.mxu3 %v707_v9  ;;  %v1266_v20 = vpop.eup %1265 }
 0x3e4   :  { %v662_v13 = vmul.f32 %v1266_v20, %v645_v6  ;;  %vm667_vm12 = vweird.f32 %v1266_v20 }
 0x3e5   :  { %vm668_vm14 = vmor %vm666_vm13, %vm667_vm12 }
 0x3e6   :  { %v663_v14 = vsub.f32 1.0, %v662_v13 }
 0x3e8   :  { %v664_v17 = vmul.f32 %v1266_v20, %v663_v14 }
 0x3ea   :  { %v665_v18 = vadd.f32 %v1266_v20, %v664_v17 }
 0x3ec   :  { %v669_v21 = vsel %vm668_vm14, %v1266_v20, %v665_v18 }
 0x3ed   :  { %v674_v22 = vsel %vm671_vm15, %v673_v19, %v669_v21 }
 0x3ee   :  { %v677_v23 = vmul.f32 %v1506_v57, %v674_v22 }
 0x3f0   :  { %v679_v24 = vpack.c.bf16 %v677_v23, %v677_v23 }
 0x3f2   :  { %1122 = vmatmul.msk.bf16.vlgmr.msrb.gmra.mxu3 %vm157_vm8, %v679_v24 }
 0x40d   :  { %v271_v25 = vpop.f32.mrf.mxu3 }
 0x40e   :  { %296 = vst.msk [vmem:[#allocation2] sm:$0xff] %vm157_vm8, %v271_v25 }
 0x415   :  { %v273_v26 = vpop.f32.mrf.mxu3 }
 0x416   :  { %v1180_v26 = vld [vmem:[%s1665_s9 + $0x8] sm:$0xff] }
 0x417   :  { %895 = vmatpush.bf16.msra.mxu1 %v1180_v26  ;;  %v1183_v26 = vld [vmem:[%s1667_s11 + $0x10] sm:$0xff] }
 0x422   :  { %v292_v27 = vpop.f32.mrf.mxu3 }
 0x423   :  { %297 = vst.msk [vmem:[#allocation2 + $0x20] sm:$0xff] %vm157_vm8, %v292_v27 }
 0x42a   :  { %v294_v28 = vpop.f32.mrf.mxu3 }
 0x42b   :  { %v1179_v28 = vld [vmem:[%s1665_s9] sm:$0xff]  ;;  %s1084_s9 = sshll.u32 %s1316_s19, 4  ;;  %s1085_s9 = int_to_ptr.vmem [resolvable:$true] %s1084_s9 }
 0x42c   :  { %896 = vmatpush.bf16.msra.mxu1 %v1179_v28 }
 0x432   :  { %v413_v29 = vpop.f32.mrf.mxu3 }
 0x433   :  { %438 = vst.msk [vmem:[#allocation2 + $0x8] sm:$0xff] %vm157_vm8, %v413_v29 }
 0x435   :  { %v555_v30 = vpop.f32.mrf.mxu2 }
 0x436   :  { %580 = vst.msk [vmem:[#allocation2 + $0x10] sm:$0xff] %vm157_vm8, %v555_v30 }
 0x43a   :  { %v415_v31 = vpop.f32.mrf.mxu3 }
 0x43d   :  { %v557_v32 = vpop.f32.mrf.mxu2 }
 0x442   :  { %v434_v57 = vpop.f32.mrf.mxu3 }
 0x443   :  { %439 = vst.msk [vmem:[#allocation2 + $0x28] sm:$0xff] %vm157_vm8, %v434_v57 }
 0x44a   :  { %v436_v33 = vpop.f32.mrf.mxu3 }
 0x45e   :  { %v697_v34 = vpop.f32.mrf.mxu2 }
 0x45f   :  { %722 = vst.msk [vmem:[#allocation2 + $0x18] sm:$0xff] %vm157_vm8, %v697_v34 }
 0x465   :  { %v576_v35 = vpop.f32.mrf.mxu3 }
 0x466   :  { %581 = vst.msk [vmem:[#allocation2 + $0x30] sm:$0xff] %vm157_vm8, %v576_v35  ;;  %v699_v36 = vpop.f32.mrf.mxu2  ;;  %v736_v62 = vld [vmem:[#allocation2 + $0x3] ss:$4 sm:$0xff]  ;;  %v732_v38 = vld [vmem:[#allocation2 + $0x2] ss:$4 sm:$0xff] }
 0x467   :  { %v728_v15 = vld [vmem:[#allocation2 + $0x1] ss:$4 sm:$0xff]  ;;  %v724_v8 = vld [vmem:[#allocation2] ss:$4 sm:$0xff] }
 0x46d   :  { %v578_v4 = vpop.f32.mrf.mxu3 }
 0x475   :  { %v718_v37 = vpop.f32.mrf.mxu3 }
 0x476   :  { %723 = vst.msk [vmem:[#allocation2 + $0x38] sm:$0xff] %vm157_vm8, %v718_v37 }
 0x47d   :  { %v720_v39 = vpop.f32.mrf.mxu3  ;;  %v738_v40 = vld [vmem:[#allocation2 + $0x23] ss:$4 sm:$0xff]  ;;  %v734_v41 = vld [vmem:[#allocation2 + $0x22] ss:$4 sm:$0xff]  ;;  %v730_v42 = vld [vmem:[#allocation2 + $0x21] ss:$4 sm:$0xff] }
 0x47e   :  { %v1216_v43 = vpack.i.bf16 %v738_v40, %v736_v62  ;;  %v1211_v44 = vpack.i.bf16 %v734_v41, %v732_v38  ;;  %v1206_v45 = vpack.i.bf16 %v730_v42, %v728_v15  ;;  %v726_v53 = vld [vmem:[#allocation2 + $0x20] ss:$4 sm:$0xff] }
 0x480   :  { %1217 = vrot.lane.b32.xlu0 %v1216_v43, %s1313_s28  ;;  %1212 = vrot.lane.b32.xlu1 %v1211_v44, %s1314_s0  ;;  %v1226_v43 = vld [vmem:[%s1664_s8] ss:$0 sm:$0xff] }
 0x481   :  { %1207 = vrot.lane.b32.xlu2 %v1206_v45, %s1315_s29 }
 0x4db   :  { %v1208_v48 = vpop.permute.xlu2 %1207 }
 0x4dc   :  { %v1210_v49 = vunpack.i.h.bf16 %v1208_v48  ;;  %v1209_v50 = vunpack.i.l.bf16 %v1208_v48 }
 0x4de   :  { %v763_v59 = vsel %vm157_vm8, %v724_v8, %v1209_v50  ;;  %v764_v61 = vsel %vm157_vm8, %v726_v53, %v1210_v49  ;;  %v1227_v50 = vld [vmem:[%s1666_s10] ss:$0 sm:$0xff]  ;;  %v1188_v8 = vld [vmem:[%s1667_s11 + $0x38] sm:$0xff] }
 0x4df   :  { %1060 = vmatpush.bf16.msrb.mxu2 %v1188_v8 }
 0x4f2   :  { %v1218_v51 = vpop.permute.xlu0 %1217  ;;  %v1213_v52 = vpop.permute.xlu1 %1212 }
 0x4f3   :  { %v1220_v54 = vunpack.i.h.bf16 %v1218_v51  ;;  %v1219_v55 = vunpack.i.l.bf16 %v1218_v51  ;;  %v1215_v56 = vunpack.i.h.bf16 %v1213_v52  ;;  %v1214_v58 = vunpack.i.l.bf16 %v1213_v52 }
 0x4f5   :  { %v766_v63 = vsel %vm765_vm9, %v763_v59, %v1214_v58  ;;  %v767_v0 = vsel %vm765_vm9, %v764_v61, %v1215_v56 }
 0x4f6   :  { %v769_v1 = vsel %vm768_vm1, %v766_v63, %v1219_v55  ;;  %v770_v60 = vsel %vm768_vm1, %v767_v0, %v1220_v54  ;;  %v1187_v55 = vld [vmem:[%s1667_s11 + $0x30] sm:$0xff]  ;;  %v1186_v0 = vld [vmem:[%s1667_s11 + $0x28] sm:$0xff] }
 0x4f7   :  { %v771_v3 = vpack.c.bf16 %v770_v60, %v769_v1  ;;  %1061 = vmatpush.bf16.msrb.mxu2 %v1187_v55 }
 0x4f9   :  { %1131 = vmatmul.msk.bf16.vlgmr.msra.gmra.mxu0 %vm50_vm0, %v771_v3 }
 0x4fb   :  { %1062 = vmatpush.bf16.msrb.mxu2 %v1186_v0 }
 0x576   :  { %v804_v6 = vpop.f32.mrf.mxu0 }
 0x577   :  { %v1569_v2 = vadd.f32 %v1224_v5, %v804_v6 }
 0x579   :  { %v811_v7 = vsel %vm50_vm0, %v1569_v2, 0.0 }
 0x57a   :  { %812 = vadd.xlane.f32.xlu1 %v811_v7  ;;  %v1185_v7 = vld [vmem:[%s1667_s11 + $0x20] sm:$0xff] }
 0x57b   :  { %1063 = vmatpush.bf16.msrb.mxu2 %v1185_v7 }
 0x57e   :  { %v806_v9 = vpop.f32.mrf.mxu0 }
 0x57f   :  { %v1573_v11 = vadd.f32 %v1224_v5, %v806_v9 }
 0x581   :  { %v814_v20 = vsel %vm50_vm0, %v1573_v11, 0.0 }
 0x582   :  { %815 = vadd.xlane.f32.xlu0 %v814_v20 }
 0x5ed   :  { %v813_v13 = vpop.xlane.xlu1 %812 }
 0x5ee   :  { %v817_v14 = vmul.f32 %v813_v13, %v1396_v10 }
 0x5f0   :  { %v819_v16 = vsub.f32 %v1569_v2, %v817_v14 }
 0x5f2   :  { %v821_v17 = vmul.f32 %v819_v16, %v819_v16 }
 0x5f4   :  { %v823_v12 = vsel %vm50_vm0, %v821_v17, 0.0 }
 0x5f5   :  { %v816_v18 = vpop.xlane.xlu0 %815  ;;  %824 = vadd.xlane.f32.xlu2 %v823_v12  ;;  %v1184_v12 = vld [vmem:[%s1667_s11 + $0x18] sm:$0xff] }
 0x5f6   :  { %v818_v19 = vmul.f32 %v816_v18, %v1396_v10  ;;  %1064 = vmatpush.bf16.msrb.mxu2 %v1184_v12 }
 0x5f8   :  { %v820_v21 = vsub.f32 %v1573_v11, %v818_v19 }
 0x5fa   :  { %v822_v22 = vmul.f32 %v820_v21, %v820_v21  ;;  %1065 = vmatpush.bf16.msrb.mxu2 %v1183_v26  ;;  %v1228_v26 = vld [vmem:[%s1668_s12] ss:$0 sm:$0xff]  ;;  %s1317_s12 = smov 128  }
 0x5fc   :  { %v826_v23 = vsel %vm50_vm0, %v822_v22, 0.0 }
 0x5fd   :  { %827 = vadd.xlane.f32.xlu1 %v826_v23 }
 0x668   :  { %v825_v24 = vpop.xlane.xlu2 %824 }
 0x669   :  { %v829_v25 = vmul.f32 %v825_v24, %v1396_v10 }
 0x66b   :  { %v831_v27 = vadd.f32 1e-05, %v829_v25 }
 0x66d   :  { %1267 = vrsqrt.f32 %v831_v27  ;;  %vm839_vm2 = vweird.f32 %v831_v27 }
 0x670   :  { %v828_v29 = vpop.xlane.xlu1 %827 }
 0x671   :  { %v830_v30 = vmul.f32 %v828_v29, %v1396_v10  ;;  %v1225_v10 = vld [vmem:[%s1663_s7] ss:$0 sm:$0xff] }
 0x673   :  { %v1268_v31 = vpop.eup %1267  ;;  %v832_v32 = vadd.f32 1e-05, %v830_v30 }
 0x674   :  { %v834_v57 = vmul.f32 %v1268_v31, %v831_v27  ;;  %vm840_vm8 = vweird.f32 %v1268_v31 }
 0x675   :  { %1269 = vrsqrt.f32 %v832_v32  ;;  %vm841_vm3 = vmor %vm839_vm2, %vm840_vm8  ;;  %vm849_vm5 = vweird.f32 %v832_v32 }
 0x676   :  { %v835_v33 = vmul.f32 %v1268_v31, %v834_v57  ;;  %v1182_v57 = vld [vmem:[%s1667_s11 + $0x8] sm:$0xff] }
 0x677   :  { %1066 = vmatpush.bf16.msrb.mxu2 %v1182_v57 }
 0x678   :  { %v836_v34 = vmul.f32 0.5, %v835_v33 }
 0x67a   :  { %v837_v35 = vsub.f32 1.5, %v836_v34 }
 0x67b   :  { %v1270_v36 = vpop.eup %1269 }
 0x67c   :  { %v838_v4 = vmul.f32 %v1268_v31, %v837_v35  ;;  %v844_v37 = vmul.f32 %v1270_v36, %v832_v32  ;;  %vm850_vm4 = vweird.f32 %v1270_v36 }
 0x67d   :  { %vm851_vm6 = vmor %vm849_vm5, %vm850_vm4 }
 0x67e   :  { %v845_v62 = vmul.f32 %v1270_v36, %v844_v37  ;;  %v842_v38 = vsel %vm841_vm3, %v1268_v31, %v838_v4  ;;  %v1181_v37 = vld [vmem:[%s1667_s11] sm:$0xff] }
 0x67f   :  { %v853_v40 = vmul.f32 %v842_v38, %v819_v16  ;;  %1067 = vmatpush.bf16.msrb.mxu2 %v1181_v37 }
 0x680   :  { %v846_v15 = vmul.f32 0.5, %v845_v62 }
 0x681   :  { %v858_v44 = vmul.f32 %v1225_v10, %v853_v40 }
 0x682   :  { %v847_v39 = vsub.f32 1.5, %v846_v15 }
 0x683   :  { %v863_v47 = vadd.f32 %v1226_v43, %v858_v44 }
 0x684   :  { %v848_v41 = vmul.f32 %v1270_v36, %v847_v39 }
 0x686   :  { %v852_v42 = vsel %vm851_vm6, %v1270_v36, %v848_v41 }
 0x687   :  { %v854_v45 = vmul.f32 %v852_v42, %v820_v21 }
 0x689   :  { %v859_v46 = vmul.f32 %v1225_v10, %v854_v45 }
 0x68b   :  { %v864_v48 = vadd.f32 %v1226_v43, %v859_v46 }
 0x68d   :  { %v865_v49 = vpack.c.bf16 %v864_v48, %v863_v47 }
 0x68f   :  { %1140 = vmatmul.msk.bf16.vlgmr.msra.gmra.mxu1 %vm50_vm0, %v865_v49 }
 0x70c   :  { %v898_v51 = vpop.f32.mrf.mxu1 }
 0x70d   :  { %v1601_v52 = vadd.f32 %v1227_v50, %v898_v51 }
 0x70f   :  { %v1607_v53 = vmul.f32 0.70710677, %v1601_v52 }
 0x711   :  { %v907_v54 = vmul.f32 %v1607_v53, %v1607_v53 }
 0x713   :  { %v908_v56 = vmin.f32 %v907_v54, 16.0 }
 0x714   :  { %v900_v58 = vpop.f32.mrf.mxu1 }
 0x715   :  { %v909_v59 = vmul.f32 2.1237322e-06, %v908_v56  ;;  %v920_v61 = vmul.f32 3.8918573e-05, %v908_v56  ;;  %v1614_v63 = vadd.f32 %v1227_v50, %v900_v58 }
 0x717   :  { %v910_v1 = vadd.f32 0.00028619796, %v909_v59  ;;  %v921_v60 = vadd.f32 0.001143296, %v920_v61  ;;  %v1620_v3 = vmul.f32 0.70710677, %v1614_v63 }
 0x719   :  { %v922_v5 = vmul.f32 %v921_v60, %v908_v56  ;;  %v947_v6 = vmul.f32 %v1620_v3, %v1620_v3  ;;  %v911_v9 = vmul.f32 %v910_v1, %v908_v56 }
 0x71b   :  { %v923_v20 = vadd.f32 0.014752088, %v922_v5  ;;  %v948_v13 = vmin.f32 %v947_v6, 16.0  ;;  %v912_v18 = vadd.f32 0.0036580483, %v911_v9 }
 0x71d   :  { %v924_v14 = vmul.f32 %v923_v20, %v908_v56  ;;  %v949_v16 = vmul.f32 2.1237322e-06, %v948_v13  ;;  %v960_v17 = vmul.f32 3.8918573e-05, %v948_v13  ;;  %v913_v27 = vmul.f32 %v912_v18, %v908_v56 }
 0x71f   :  { %v925_v19 = vadd.f32 0.112945676, %v924_v14  ;;  %v950_v21 = vadd.f32 0.00028619796, %v949_v16  ;;  %v961_v22 = vadd.f32 0.001143296, %v960_v17 }
 0x720   :  { %v914_v33 = vadd.f32 0.05243302, %v913_v27 }
 0x721   :  { %v926_v23 = vmul.f32 %v925_v19, %v908_v56  ;;  %v951_v24 = vmul.f32 %v950_v21, %v948_v13  ;;  %v962_v25 = vmul.f32 %v961_v22, %v948_v13  ;;  %v903_v19 = vmul.f32 0.5, %v1601_v52 }
 0x722   :  { %v915_v62 = vmul.f32 %v914_v33, %v908_v56  ;;  %v904_v21 = vmul.f32 0.5, %v1614_v63 }
 0x723   :  { %v927_v28 = vadd.f32 0.4994258, %v926_v23  ;;  %v952_v29 = vadd.f32 0.0036580483, %v951_v24  ;;  %v963_v30 = vadd.f32 0.014752088, %v962_v25 }
 0x724   :  { %v916_v40 = vadd.f32 0.18741608, %v915_v62 }
 0x725   :  { %v928_v31 = vmul.f32 %v927_v28, %v908_v56  ;;  %v964_v32 = vmul.f32 %v963_v30, %v948_v13  ;;  %v953_v35 = vmul.f32 %v952_v29, %v948_v13  ;;  %v1074_v28 = vadd.f32 %v1569_v2, %v1569_v2 }
 0x726   :  { %v917_v45 = vmul.f32 %v916_v40, %v908_v56  ;;  %v1075_v30 = vadd.f32 %v1573_v11, %v1573_v11 }
 0x727   :  { %v929_v34 = vadd.f32 1.0, %v928_v31  ;;  %v965_v36 = vadd.f32 0.112945676, %v964_v32  ;;  %v954_v38 = vadd.f32 0.05243302, %v953_v35 }
 0x728   :  { %v918_v51 = vadd.f32 1.1283791, %v917_v45 }
 0x729   :  { %1271 = vrcp.f32 %v929_v34  ;;  %v966_v4 = vmul.f32 %v965_v36, %v948_v13  ;;  %v955_v42 = vmul.f32 %v954_v38, %v948_v13  ;;  %v941_v47 = vand.u32 2147483648, %v929_v34 }
 0x72a   :  { %v939_v49 = vand.u32 2147483647, %v929_v34  ;;  %vm935_vm10 = vweird.f32 %v929_v34  ;;  %v919_v0 = vmul.f32 %v918_v51, %v1607_v53 }
 0x72b   :  { %v967_v15 = vadd.f32 0.4994258, %v966_v4  ;;  %v956_v48 = vadd.f32 0.18741608, %v955_v42  ;;  %v942_v55 = vor.u32 1.1754944e-38, %v941_v47 }
 0x72c   :  { %vm940_vm12 = vcmp.eq.f32.partialorder %v939_v49, 8.507059e+37 }
 0x72d   :  { %v968_v39 = vmul.f32 %v967_v15, %v948_v13  ;;  %v957_v58 = vmul.f32 %v956_v48, %v948_v13 }
 0x72f   :  { %v1272_v10 = vpop.eup %1271  ;;  %v969_v43 = vadd.f32 1.0, %v968_v39  ;;  %v958_v56 = vadd.f32 1.1283791, %v957_v58 }
 0x730   :  { %v931_v41 = vmul.f32 %v1272_v10, %v929_v34  ;;  %vm936_vm7 = vweird.f32 %v1272_v10 }
 0x731   :  { %1273 = vrcp.f32 %v969_v43  ;;  %vm937_vm11 = vmor %vm935_vm10, %vm936_vm7  ;;  %v981_v60 = vand.u32 2147483648, %v969_v43  ;;  %v979_v7 = vand.u32 2147483647, %v969_v43  ;;  %vm975_vm14 = vweird.f32 %v969_v43 }
 0x732   :  { %v932_v44 = vsub.f32 1.0, %v931_v41  ;;  %v959_v16 = vmul.f32 %v958_v56, %v1620_v3 }
 0x733   :  { %v982_v20 = vor.u32 1.1754944e-38, %v981_v60  ;;  %vm980_vm9 = vcmp.eq.f32.partialorder %v979_v7, 8.507059e+37 }
 0x734   :  { %v933_v46 = vmul.f32 %v1272_v10, %v932_v44 }
 0x736   :  { %v934_v50 = vadd.f32 %v1272_v10, %v933_v46 }
 0x737   :  { %v1274_v8 = vpop.eup %1273 }
 0x738   :  { %v938_v54 = vsel %vm937_vm11, %v1272_v10, %v934_v50  ;;  %v971_v59 = vmul.f32 %v1274_v8, %v969_v43  ;;  %vm976_vm13 = vweird.f32 %v1274_v8 }
 0x739   :  { %v943_v61 = vsel %vm940_vm12, %v942_v55, %v938_v54  ;;  %vm977_vm15 = vmor %vm975_vm14, %vm976_vm13 }
 0x73a   :  { %v972_v1 = vsub.f32 1.0, %v971_v59  ;;  %v944_v5 = vmul.f32 %v943_v61, %v919_v0 }
 0x73c   :  { %v973_v6 = vmul.f32 %v1274_v8, %v972_v1  ;;  %v1141_v14 = vclamps-f32 %v944_v5, 1.0 }
 0x73e   :  { %v974_v9 = vadd.f32 %v1274_v8, %v973_v6  ;;  %v987_v18 = vadd.f32 1.0, %v1141_v14 }
 0x740   :  { %v978_v13 = vsel %vm977_vm15, %v1274_v8, %v974_v9  ;;  %v989_v23 = vmul.f32 %v987_v18, %v903_v19 }
 0x741   :  { %v983_v17 = vsel %vm980_vm9, %v982_v20, %v978_v13 }
 0x742   :  { %v984_v12 = vmul.f32 %v983_v17, %v959_v16 }
 0x744   :  { %v1142_v53 = vclamps-f32 %v984_v12, 1.0 }
 0x746   :  { %v988_v22 = vadd.f32 1.0, %v1142_v53 }
 0x748   :  { %v990_v24 = vmul.f32 %v988_v22, %v904_v21 }
 0x74a   :  { %v991_v25 = vpack.c.bf16 %v990_v24, %v989_v23 }
 0x74c   :  { %1068 = vmatmul.bf16.vlgmr.msrb.gmra.mxu2 %v991_v25 }
 0x7cf   :  { %v1069_v3 = vpop.f32.mrf.mxu2 }
 0x7d0   :  { %v1070_v27 = vadd.f32 %v1228_v26, %v1069_v3 }
 0x7d2   :  { %v1076_v29 = vadd.f32 %v1074_v28, %v1070_v27 }
 0x7d4   :  { %1078 = vst.msk [vmem:[#allocation3] sm:$0xff] %vm50_vm0, %v1076_v29 }
 0x7d7   :  { %v1071_v52 = vpop.f32.mrf.mxu2 }
 0x7d8   :  { %v1072_v63 = vadd.f32 %v1228_v26, %v1071_v52 }
 0x7da   :  { %v1077_v31 = vadd.f32 %v1075_v30, %v1072_v63 }
 0x7dc   :  { %1079 = vst.msk [vmem:[#allocation3 + $0x8] sm:$0xff] %vm50_vm0, %v1077_v31 }
 0x7dd   :  { %1092 = dma.vmem_to_hbm [thread:$0]  %s1085_s9, 256, %s1087_s18, [#allocation4], %s1317_s12, %s1317_s12, %s1315_s29  }
 0x7de   :  { %1299 = dma.done.wait [#allocation4], 256  }
 0x7df   :  { %1300 = vsyncadd [#allocation4], 4294967040 }
 0x7e0   :  { %1097 = vsyncpa [#allocation4], 1 }

</bundles_post_ra>
